<compile_context>
chip_gen: v5e
topology: v5e:2x2
jax: 0.10.0
libtpu: 0.0.40
codegen_flags: <defaults>
</compile_context>

<pallas_src>
import jax
import jax.numpy as jnp
from jax import lax
from jax.experimental import pallas as pl
from jax.experimental.pallas import tpu as pltpu


# ---------------------------------------------------------------------------
# hardware-aware helpers
# ---------------------------------------------------------------------------
def _tpu_info():
    try:
        return pltpu.get_tpu_info()
    except Exception:
        return None


def _num_tensorcores():
    """Best-effort TensorCore-per-chip count; default 1 (safe for v5e/v6e)."""
    info = _tpu_info()
    if info is not None:
        for attr in ("num_cores", "core_count", "num_tensorcores",
                     "tensorcore_count", "cores_per_chip", "num_cores_per_chip"):
            v = getattr(info, attr, None)
            if isinstance(v, int) and v > 0:
                return v
    return 1


def _vmem_limit(block_bytes):
    """Scoped-VMEM limit sized from the per-step block working set (w/ double buffering)."""
    cap = 64 << 20  # conservative default = v7x physical VMEM per TC
    info = _tpu_info()
    if info is not None:
        v = getattr(info, "vmem_capacity_bytes", None)
        if isinstance(v, int) and v > 0:
            cap = v
    want = int(2.2 * block_bytes) + (4 << 20)          # double-buffer + headroom
    return int(max(32 << 20, min(want, int(0.9 * cap))))


# ---------------------------------------------------------------------------
# 1) input-to-hidden gates precompute: gates = X @ W_ih^T + (b_ih + b_hh)
# ---------------------------------------------------------------------------
def _gates_x_kernel(x_ref, w_ref, b_ref, o_ref):
    o_ref[...] = (
        jnp.dot(x_ref[...], w_ref[...], preferred_element_type=jnp.float32)
        + b_ref[...]
    ).astype(o_ref.dtype)


def input_gates(x_rows, w_ih, b_ih, b_hh, *, row_tile=512):
    """x_rows: (N, E) f32 (time-major flattened) -> gates: (N, 4H) bf16 (bias folded in)."""
    N, E = x_rows.shape
    G = w_ih.shape[0]                      # 4H
    wih_t = jnp.transpose(w_ih)            # (E, 4H) — small weight, done once
    bias = (b_ih + b_hh).reshape(1, G)

    tm = N if N <= row_tile else row_tile
    grid = (pl.cdiv(N, tm),)
    vlim = _vmem_limit(tm * E * 4 + E * G * 4 + G * 4 + tm * G * 2)

    return pl.pallas_call(
        _gates_x_kernel,
        out_shape=jax.ShapeDtypeStruct((N, G), jnp.bfloat16),
        grid=grid,
        in_specs=[
            pl.BlockSpec((tm, E), lambda i: (i, 0)),
            pl.BlockSpec((E, G), lambda i: (0, 0)),
            pl.BlockSpec((1, G), lambda i: (0, 0)),
        ],
        out_specs=pl.BlockSpec((tm, G), lambda i: (i, 0)),
        compiler_params=pltpu.CompilerParams(
            dimension_semantics=("parallel",), vmem_limit_bytes=vlim),
        cost_estimate=pl.CostEstimate(
            flops=2 * N * E * G,
            transcendentals=0,
            bytes_accessed=4 * (N * E + E * G + G) + 2 * N * G),
    )(x_rows, wih_t, bias)


# ---------------------------------------------------------------------------
# 2) LSTM recurrence over time chunks (time-major slabs; only h @ W_hh^T serial)
# ---------------------------------------------------------------------------
def _lstm_chunk_kernel(gx_ref, whh_ref, hseq_ref, h_sc, c_sc):
    # gx_ref:   (TC, Bs, 4H) bf16  time-major precomputed input gates (+bias)
    # whh_ref:  (H, 4H)      bf16  recurrent weight (transposed), constant across grid
    # hseq_ref: (TC, Bs, H)  f32   time-major hidden-state output slab
    # h_sc/c_sc:(Bs, H)      f32   carries across time chunks (VMEM scratch)
    @pl.when(pl.program_id(1) == 0)
    def _():
        h_sc[...] = jnp.zeros_like(h_sc)
        c_sc[...] = jnp.zeros_like(c_sc)

    H = h_sc.shape[1]
    TC = gx_ref.shape[0]
    whh = whh_ref[...]                     # hoist weight load out of the time loop

    def step(tt, carry):
        h, c = carry
        # clean (Bs, 4H) tile load + bf16 MXU matmul with f32 accumulate
        gates = gx_ref[tt].astype(jnp.float32) + jnp.dot(
            h.astype(jnp.bfloat16), whh, preferred_element_type=jnp.float32)
        # PyTorch gate order [i, f, g, o]; slices are lane-tile aligned when H % 128 == 0.
        i = jax.nn.sigmoid(gates[:, 0:H])
        f = jax.nn.sigmoid(gates[:, H:2 * H])
        g = jnp.tanh(gates[:, 2 * H:3 * H])
        o = jax.nn.sigmoid(gates[:, 3 * H:4 * H])
        c = f * c + i * g
        h = o * jnp.tanh(c)
        hseq_ref[tt] = h                   # clean (Bs, H) tile store (time-major)
        return (h, c)

    unroll = max(u for u in (8, 4, 2, 1) if TC % u == 0)
    h, c = lax.fori_loop(0, TC, step, (h_sc[...], c_sc[...]), unroll=unroll)
    # NOTE: for a ragged last chunk the padded steps compute garbage, but their stores are
    # dropped and the carry is never consumed afterwards (final (h, c) is not an output).
    h_sc[...] = h
    c_sc[...] = c


def lstm_recurrence(gates_x_tm, w_hh, *, time_chunk=32, num_cores=None):
    """gates_x_tm: (T, B, 4H) bf16, w_hh: (4H, H) f32 -> hidden sequence (T, B, H) f32."""
    T, B, G = gates_x_tm.shape
    H = w_hh.shape[1]
    assert G == 4 * H
    whh_t = jnp.transpose(w_hh).astype(jnp.bfloat16)   # (H, 4H) bf16 (halves VMEM, 3x MXU)

    # Split the batch across TensorCores only where it actually shards (2 TCs on v7x);
    # on 1-TC chips a split would just double the serial chain.
    if num_cores is None:
        num_cores = _num_tensorcores()
    splits = 2 if (num_cores >= 2 and B % 2 == 0 and (B // 2) % 8 == 0) else 1
    Bs = B // splits
    TC = T if T <= time_chunk else time_chunk
    n_chunks = pl.cdiv(T, TC)

    vlim = _vmem_limit(TC * Bs * G * 2 + H * G * 2 + TC * Bs * H * 4 + 2 * Bs * H * 4)

    return pl.pallas_call(
        _lstm_chunk_kernel,
        out_shape=jax.ShapeDtypeStruct((T, B, H), jnp.float32),
        grid_spec=pltpu.PrefetchScalarGridSpec(
            num_scalar_prefetch=0,
            grid=(splits, n_chunks),
            in_specs=[
                pl.BlockSpec((TC, Bs, G), lambda bb, c: (c, bb, 0)),   # gates slab (time-major)
                pl.BlockSpec((H, G), lambda bb, c: (0, 0)),            # W_hh^T (constant)
            ],
            out_specs=pl.BlockSpec((TC, Bs, H), lambda bb, c: (c, bb, 0)),
            scratch_shapes=[
                pltpu.VMEM((Bs, H), jnp.float32),   # h carry
                pltpu.VMEM((Bs, H), jnp.float32),   # c carry
            ],
        ),
        compiler_params=pltpu.CompilerParams(
            dimension_semantics=("parallel", "arbitrary"),   # time is sequential
            vmem_limit_bytes=vlim),
        cost_estimate=pl.CostEstimate(
            flops=2 * B * T * H * G + 10 * B * T * H,
            transcendentals=5 * B * T * H,
            bytes_accessed=2 * B * T * G + 2 * H * G + 4 * B * T * H),
    )(gates_x_tm, whh_t)


# ---------------------------------------------------------------------------
# 3) output projection with the final permute(0, 2, 1) fused into the kernel
# ---------------------------------------------------------------------------
def _proj_permute_kernel(h_ref, w_ref, b_ref, o_ref):
    # h_ref: (1, Tt, H); w_ref: (Vt, H); b_ref: (Vt, 1); o_ref: (1, Vt, Tt)
    # out[v, t] = sum_h W[v, h] * hseq[t, h] — NT contraction, no transpose materialized,
    # and the logits tile lands directly in the (B, V, T) layout.
    o_ref[0] = (
        lax.dot_general(w_ref[...], h_ref[0],
                        dimension_numbers=(((1,), (1,)), ((), ())),
                        preferred_element_type=jnp.float32)
        + b_ref[...]
    ).astype(o_ref.dtype)


def output_projection_permuted(hseq, w_out, b_out, *, t_tile=256, v_tile=2048):
    """hseq: (B, T, H) f32 -> logits already permuted to (B, V, T)."""
    B, T, H = hseq.shape
    V = w_out.shape[0]
    bias = b_out.reshape(V, 1)

    # Lane-dense logits stores: pad T to a multiple of 128 (slice off afterwards).
    LANE = 128
    Tp = T if T % LANE == 0 else ((T + LANE - 1) // LANE) * LANE
    if Tp != T:
        hseq = jnp.pad(hseq, ((0, 0), (0, Tp - T), (0, 0)))
    Tt = t_tile if Tp % t_tile == 0 else LANE
    Vt = V if V <= v_tile else v_tile          # 2048: multiple of the 256-wide MXU

    # Weight tiles outermost so each W_out tile is streamed from HBM only once.
    grid = (pl.cdiv(V, Vt), B, Tp // Tt)
    vlim = _vmem_limit(Tt * H * 4 + Vt * H * 4 + Vt * 4 + Vt * Tt * 4)

    logits = pl.pallas_call(
        _proj_permute_kernel,
        out_shape=jax.ShapeDtypeStruct((B, V, Tp), jnp.float32),
        grid=grid,
        in_specs=[
            pl.BlockSpec((1, Tt, H), lambda vj, b, ti: (b, ti, 0)),   # hseq (batch-major)
            pl.BlockSpec((Vt, H), lambda vj, b, ti: (vj, 0)),         # W_out (V, H), no transpose
            pl.BlockSpec((Vt, 1), lambda vj, b, ti: (vj, 0)),         # bias as column
        ],
        out_specs=pl.BlockSpec((1, Vt, Tt), lambda vj, b, ti: (b, vj, ti)),
        compiler_params=pltpu.CompilerParams(
            dimension_semantics=("parallel", "parallel", "parallel"),
            vmem_limit_bytes=vlim),
        cost_estimate=pl.CostEstimate(
            flops=2 * B * Tp * H * V,
            transcendentals=0,
            bytes_accessed=4 * (B * Tp * H * pl.cdiv(V, Vt) + V * H + V + B * V * Tp)),
    )(hseq, w_out, bias)
    return logits if Tp == T else logits[:, :, :T]


# ---------------------------------------------------------------------------
# parameters (deterministic init matching the torch module's init scheme)
# ---------------------------------------------------------------------------
def init_params(key, vocab, emb_size, hidden, pad_index=0):
    k_emb, k_ih, k_hh, k_w, k_b = jax.random.split(key, 5)
    # nn.Embedding(vocab, emb_size, padding_idx=pad_index)
    emb = jax.random.normal(k_emb, (vocab, emb_size), jnp.float32)
    emb = emb.at[pad_index].set(0.0)
    # W_ih: xavier uniform, shape (4H, E)
    limit = (6.0 / (emb_size + 4 * hidden)) ** 0.5
    w_ih = jax.random.uniform(k_ih, (4 * hidden, emb_size), jnp.float32, -limit, limit)
    # W_hh: orthogonal columns, shape (4H, H)
    a = jax.random.normal(k_hh, (4 * hidden, hidden), jnp.float32)
    w_hh, _ = jnp.linalg.qr(a)
    # biases: zero except forget gate = 1 (both b_ih and b_hh, as in the module -> combined 2)
    b_ih = jnp.zeros((4 * hidden,), jnp.float32).at[hidden:2 * hidden].set(1.0)
    b_hh = jnp.zeros((4 * hidden,), jnp.float32).at[hidden:2 * hidden].set(1.0)
    # output Linear(hidden, vocab): torch default uniform(-1/sqrt(H), 1/sqrt(H))
    bound = 1.0 / (hidden ** 0.5)
    w_out = jax.random.uniform(k_w, (vocab, hidden), jnp.float32, -bound, bound)
    b_out = jax.random.uniform(k_b, (vocab,), jnp.float32, -bound, bound)
    return dict(emb=emb, w_ih=w_ih, w_hh=w_hh, b_ih=b_ih, b_hh=b_hh,
                w_out=w_out, b_out=b_out)


# ---------------------------------------------------------------------------
# full forward (eval mode: variational dropouts are identity, dropoutw = 0)
# ---------------------------------------------------------------------------
def lstm_lm_forward(params, token_ids):
    # Time-major embedding gather: no activation transpose, and the recurrence's per-step
    # loads/stores become clean (sublane=B, lane=·) tile accesses.
    emb_tm = jnp.take(params["emb"], token_ids.T, axis=0)                     # (T, B, E)
    T, B, E = emb_tm.shape
    gx = input_gates(emb_tm.reshape(T * B, E),
                     params["w_ih"], params["b_ih"], params["b_hh"])          # (T*B, 4H) bf16
    gx = gx.reshape(T, B, -1)                                                 # contiguous reshape
    hseq_tm = lstm_recurrence(gx, params["w_hh"])                             # (T, B, H) f32
    # One small XLA transpose (B*T*H, a few % of the logits traffic) so the projection keeps
    # its batch-major input layout and lane-dense (B, V, T) output stores.
    hseq = jnp.transpose(hseq_tm, (1, 0, 2))                                  # (B, T, H)
    return output_projection_permuted(hseq, params["w_out"], params["b_out"])  # (B, V, T)


# pure-JAX f32 reference (lax.scan LSTM) for correctness validation
def reference_forward(params, token_ids):
    emb = jnp.take(params["emb"], token_ids, axis=0)
    B, T, E = emb.shape
    H = params["w_hh"].shape[1]
    wih_t = params["w_ih"].T
    whh_t = params["w_hh"].T
    bias = params["b_ih"] + params["b_hh"]

    def step(carry, x):
        h, c = carry
        gates = x @ wih_t + h @ whh_t + bias
        i = jax.nn.sigmoid(gates[:, 0:H])
        f = jax.nn.sigmoid(gates[:, H:2 * H])
        g = jnp.tanh(gates[:, 2 * H:3 * H])
        o = jax.nn.sigmoid(gates[:, 3 * H:4 * H])
        c = f * c + i * g
        h = o * jnp.tanh(c)
        return (h, c), h

    h0 = jnp.zeros((B, H), jnp.float32)
    c0 = jnp.zeros((B, H), jnp.float32)
    _, hs = jax.lax.scan(step, (h0, c0), jnp.transpose(emb, (1, 0, 2)))
    hseq = jnp.transpose(hs, (1, 0, 2))
    logits = hseq @ params["w_out"].T + params["b_out"]
    return jnp.transpose(logits, (0, 2, 1))


if __name__ == "__main__":
    B, T = 2, 8
    EMB, HID, VOCAB = 16, 32, 128
    PAD = 0

    key = jax.random.PRNGKey(0)
    k_params, k_ids = jax.random.split(key)
    params = init_params(k_params, VOCAB, EMB, HID, pad_index=PAD)
    token_ids = jax.random.randint(k_ids, (B, T), 0, VOCAB, dtype=jnp.int32)

    out = jax.jit(lstm_lm_forward)(params, token_ids)
    out = jax.block_until_ready(out)
    assert out.shape == (B, VOCAB, T), out.shape
    assert out.dtype == jnp.float32

    ref = jax.block_until_ready(jax.jit(reference_forward)(params, token_ids))
    max_err = float(jnp.max(jnp.abs(out - ref)))
    # Tolerance accounts for the bf16 gates_x storage + bf16 recurrent-matmul operands
    # (f32 accumulation / f32 gate math); a layout/logic bug would give O(1) errors.
    assert max_err < 5e-2, f"kernel/reference mismatch: max abs err {max_err}"

    print("KERNEL_OK")
</pallas_src>

<mosaic_0001>
module attributes {stable_mosaic.version = 11 : i64} {
  func.func @_proj_permute_kernel(%arg0: i32, %arg1: i32, %arg2: i32, %arg3: memref<1x128x32xf32, #tpu.memory_space<vmem>>, %arg4: memref<128x32xf32, #tpu.memory_space<vmem>>, %arg5: memref<128x1xf32, #tpu.memory_space<vmem>>, %arg6: memref<1x128x128xf32, #tpu.memory_space<vmem>>) attributes {dimension_semantics = [#tpu.dimension_semantics<parallel>, #tpu.dimension_semantics<parallel>, #tpu.dimension_semantics<parallel>], iteration_bounds = array<i64: 1, 2, 1>, scalar_prefetch = 0 : i64, scratch_operands = 0 : i64, tpu.core_type = #tpu.core_type<tc>, window_params = [{transform_indices = @transform_0, window_bounds = array<i64: 1, 128, 32>}, {transform_indices = @transform_1, window_bounds = array<i64: 128, 32>}, {transform_indices = @transform_2, window_bounds = array<i64: 128, 1>}, {transform_indices = @transform_3, window_bounds = array<i64: 1, 128, 128>}]} {
    %c0 = arith.constant 0 : index
    %c0_0 = arith.constant 0 : index
    %0 = vector.load %arg4[%c0, %c0_0] : memref<128x32xf32, #tpu.memory_space<vmem>>, vector<128x32xf32>
    %c0_1 = arith.constant 0 : index
    %c0_2 = arith.constant 0 : index
    %c0_3 = arith.constant 0 : index
    %1 = vector.load %arg3[%c0_1, %c0_2, %c0_3] : memref<1x128x32xf32, #tpu.memory_space<vmem>>, vector<1x128x32xf32>
    %2 = vector.shape_cast %1 : vector<1x128x32xf32> to vector<128x32xf32>
    %cst = arith.constant dense<0.000000e+00> : vector<128x128xf32>
    %3 = tpu.matmul %0, %2, %cst {dimension_numbers = #tpu.dot_dimension_numbers<[1], [1], [0], [0], [0, 0, 1, 0], [], []>} : vector<128x32xf32>, vector<128x32xf32>, vector<128x128xf32> -> vector<128x128xf32>
    %c0_4 = arith.constant 0 : index
    %c0_5 = arith.constant 0 : index
    %4 = vector.load %arg5[%c0_4, %c0_5] : memref<128x1xf32, #tpu.memory_space<vmem>>, vector<128x1xf32>
    %5 = vector.broadcast %4 : vector<128x1xf32> to vector<128x128xf32>
    %6 = arith.addf %3, %5 : vector<128x128xf32>
    %c0_6 = arith.constant 0 : index
    %c0_7 = arith.constant 0 : index
    %c0_8 = arith.constant 0 : index
    %7 = vector.load %arg6[%c0_6, %c0_7, %c0_8] : memref<1x128x128xf32, #tpu.memory_space<vmem>>, vector<1x128x128xf32>
    %8 = vector.shape_cast %7 : vector<1x128x128xf32> to vector<128x128xf32>
    %9 = vector.shape_cast %6 : vector<128x128xf32> to vector<1x128x128xf32>
    tpu.vector_store %arg6[%c0_6, %c0_7, %c0_8], %9 {strides = array<i32>} : memref<1x128x128xf32, #tpu.memory_space<vmem>>, vector<1x128x128xf32>,
    return
  }
  func.func @transform_0(%arg0: i32, %arg1: i32, %arg2: i32) -> (i32, i32, i32) {
    %c0_i32 = arith.constant 0 : i32
    %c0_i32_0 = arith.constant 0 : i32
    return %arg1, %arg2, %c0_i32 : i32, i32, i32
  }
  func.func @transform_1(%arg0: i32, %arg1: i32, %arg2: i32) -> (i32, i32) {
    %c0_i32 = arith.constant 0 : i32
    %c0_i32_0 = arith.constant 0 : i32
    return %arg0, %c0_i32 : i32, i32
  }
  func.func @transform_2(%arg0: i32, %arg1: i32, %arg2: i32) -> (i32, i32) {
    %c0_i32 = arith.constant 0 : i32
    %c0_i32_0 = arith.constant 0 : i32
    return %arg0, %c0_i32 : i32, i32
  }
  func.func @transform_3(%arg0: i32, %arg1: i32, %arg2: i32) -> (i32, i32, i32) {
    %c0_i32 = arith.constant 0 : i32
    return %arg1, %arg0, %arg2 : i32, i32, i32
  }
}

module attributes {stable_mosaic.version = 11 : i64} {
  func.func @_gates_x_kernel(%arg0: i32, %arg1: memref<16x16xf32, #tpu.memory_space<vmem>>, %arg2: memref<16x128xf32, #tpu.memory_space<vmem>>, %arg3: memref<1x128xf32, #tpu.memory_space<vmem>>, %arg4: memref<16x128xbf16, #tpu.memory_space<vmem>>) attributes {dimension_semantics = [#tpu.dimension_semantics<parallel>], iteration_bounds = array<i64: 1>, scalar_prefetch = 0 : i64, scratch_operands = 0 : i64, tpu.core_type = #tpu.core_type<tc>, window_params = [{transform_indices = @transform_0, window_bounds = array<i64: 16, 16>}, {pipeline_mode = #tpu.pipeline_mode<synchronous>, transform_indices = @transform_1, window_bounds = array<i64: 16, 128>}, {pipeline_mode = #tpu.pipeline_mode<synchronous>, transform_indices = @transform_2, window_bounds = array<i64: 1, 128>}, {transform_indices = @transform_3, window_bounds = array<i64: 16, 128>}]} {
    %c0 = arith.constant 0 : index
    %c0_0 = arith.constant 0 : index
    %0 = vector.load %arg1[%c0, %c0_0] : memref<16x16xf32, #tpu.memory_space<vmem>>, vector<16x16xf32>
    %c0_1 = arith.constant 0 : index
    %c0_2 = arith.constant 0 : index
    %1 = vector.load %arg2[%c0_1, %c0_2] : memref<16x128xf32, #tpu.memory_space<vmem>>, vector<16x128xf32>
    %cst = arith.constant dense<0.000000e+00> : vector<16x128xf32>
    %2 = tpu.matmul %0, %1, %cst {dimension_numbers = #tpu.dot_dimension_numbers<[1], [0], [0], [1], [0, 0, 1, 1], [], []>} : vector<16x16xf32>, vector<16x128xf32>, vector<16x128xf32> -> vector<16x128xf32>
    %c0_3 = arith.constant 0 : index
    %c0_4 = arith.constant 0 : index
    %3 = vector.load %arg3[%c0_3, %c0_4] : memref<1x128xf32, #tpu.memory_space<vmem>>, vector<1x128xf32>
    %4 = vector.broadcast %3 : vector<1x128xf32> to vector<16x128xf32>
    %5 = arith.addf %2, %4 : vector<16x128xf32>
    %6 = arith.truncf %5 : vector<16x128xf32> to vector<16x128xbf16>
    %c0_5 = arith.constant 0 : index
    %c0_6 = arith.constant 0 : index
    %7 = vector.load %arg4[%c0_5, %c0_6] : memref<16x128xbf16, #tpu.memory_space<vmem>>, vector<16x128xbf16>
    tpu.vector_store %arg4[%c0_5, %c0_6], %6 {strides = array<i32>} : memref<16x128xbf16, #tpu.memory_space<vmem>>, vector<16x128xbf16>,
    return
  }
  func.func @transform_0(%arg0: i32) -> (i32, i32) {
    %c0_i32 = arith.constant 0 : i32
    %c0_i32_0 = arith.constant 0 : i32
    return %arg0, %c0_i32 : i32, i32
  }
  func.func @transform_1(%arg0: i32) -> (i32, i32) {
    %c0_i32 = arith.constant 0 : i32
    %c0_i32_0 = arith.constant 0 : i32
    %c0_i32_1 = arith.constant 0 : i32
    return %c0_i32, %c0_i32_0 : i32, i32
  }
  func.func @transform_2(%arg0: i32) -> (i32, i32) {
    %c0_i32 = arith.constant 0 : i32
    %c0_i32_0 = arith.constant 0 : i32
    %c0_i32_1 = arith.constant 0 : i32
    return %c0_i32, %c0_i32_0 : i32, i32
  }
  func.func @transform_3(%arg0: i32) -> (i32, i32) {
    %c0_i32 = arith.constant 0 : i32
    %c0_i32_0 = arith.constant 0 : i32
    return %arg0, %c0_i32 : i32, i32
  }
}

module attributes {stable_mosaic.version = 11 : i64} {
  func.func @_lstm_chunk_kernel(%arg0: i32, %arg1: i32, %arg2: memref<8x2x128xbf16, #tpu.memory_space<vmem>>, %arg3: memref<32x128xbf16, #tpu.memory_space<vmem>>, %arg4: memref<8x2x32xf32, #tpu.memory_space<vmem>>, %arg5: memref<2x32xf32, #tpu.memory_space<vmem>>, %arg6: memref<2x32xf32, #tpu.memory_space<vmem>>) attributes {dimension_semantics = [#tpu.dimension_semantics<parallel>, #tpu.dimension_semantics<arbitrary>], iteration_bounds = array<i64: 1, 1>, scalar_prefetch = 0 : i64, scratch_operands = 2 : i64, tpu.core_type = #tpu.core_type<tc>, window_params = [{transform_indices = @transform_0, window_bounds = array<i64: 8, 2, 128>}, {pipeline_mode = #tpu.pipeline_mode<synchronous>, transform_indices = @transform_1, window_bounds = array<i64: 32, 128>}, {transform_indices = @transform_2, window_bounds = array<i64: 8, 2, 32>}]} {
    %c0_i32 = arith.constant 0 : i32
    %0 = arith.cmpi eq, %arg1, %c0_i32 : i32
    %1 = arith.extui %0 : i1 to i32
    %c0_i32_0 = arith.constant 0 : i32
    %2 = arith.cmpi ne, %1, %c0_i32_0 : i32
    scf.if %2 {
      %cst_74 = arith.constant 0.000000e+00 : f32
      %296 = vector.broadcast %cst_74 : f32 to vector<2x32xf32>
      %c0_75 = arith.constant 0 : index
      %c0_76 = arith.constant 0 : index
      %297 = vector.load %arg5[%c0_75, %c0_76] : memref<2x32xf32, #tpu.memory_space<vmem>>, vector<2x32xf32>
      tpu.vector_store %arg5[%c0_75, %c0_76], %296 {strides = array<i32>} : memref<2x32xf32, #tpu.memory_space<vmem>>, vector<2x32xf32>,
      %cst_77 = arith.constant 0.000000e+00 : f32
      %298 = vector.broadcast %cst_77 : f32 to vector<2x32xf32>
      %c0_78 = arith.constant 0 : index
      %c0_79 = arith.constant 0 : index
      %299 = vector.load %arg6[%c0_78, %c0_79] : memref<2x32xf32, #tpu.memory_space<vmem>>, vector<2x32xf32>
      tpu.vector_store %arg6[%c0_78, %c0_79], %298 {strides = array<i32>} : memref<2x32xf32, #tpu.memory_space<vmem>>, vector<2x32xf32>,
    } else {
    }
    %c0 = arith.constant 0 : index
    %c0_1 = arith.constant 0 : index
    %3 = vector.load %arg3[%c0, %c0_1] : memref<32x128xbf16, #tpu.memory_space<vmem>>, vector<32x128xbf16>
    %c0_2 = arith.constant 0 : index
    %c0_3 = arith.constant 0 : index
    %4 = vector.load %arg5[%c0_2, %c0_3] : memref<2x32xf32, #tpu.memory_space<vmem>>, vector<2x32xf32>
    %c0_4 = arith.constant 0 : index
    %c0_5 = arith.constant 0 : index
    %5 = vector.load %arg6[%c0_4, %c0_5] : memref<2x32xf32, #tpu.memory_space<vmem>>, vector<2x32xf32>
    %c0_i32_6 = arith.constant 0 : i32
    %6 = arith.index_cast %c0_i32_6 : i32 to index
    %c0_7 = arith.constant 0 : index
    %c0_8 = arith.constant 0 : index
    %7 = vector.load %arg2[%6, %c0_7, %c0_8] : memref<8x2x128xbf16, #tpu.memory_space<vmem>>, vector<1x2x128xbf16>
    %8 = vector.shape_cast %7 : vector<1x2x128xbf16> to vector<2x128xbf16>
    %9 = arith.extf %8 : vector<2x128xbf16> to vector<2x128xf32>
    %10 = arith.truncf %4 : vector<2x32xf32> to vector<2x32xbf16>
    %cst = arith.constant dense<0.000000e+00> : vector<2x128xf32>
    %11 = tpu.matmul %10, %3, %cst {dimension_numbers = #tpu.dot_dimension_numbers<[1], [0], [0], [1], [0, 0, 1, 1], [], []>} : vector<2x32xbf16>, vector<32x128xbf16>, vector<2x128xf32> -> vector<2x128xf32>
    %12 = arith.addf %9, %11 : vector<2x128xf32>
    %13 = vector.extract_strided_slice %12 {offsets = [0, 0], sizes = [2, 32], strides = [1, 1]} : vector<2x128xf32> to vector<2x32xf32>
    %14 = arith.negf %13 : vector<2x32xf32>
    %15 = math.exp %14 : vector<2x32xf32>
    %cst_9 = arith.constant 1.000000e+00 : f32
    %16 = vector.broadcast %cst_9 : f32 to vector<2x32xf32>
    %17 = arith.addf %16, %15 : vector<2x32xf32>
    %18 = arith.divf %16, %17 : vector<2x32xf32>
    %19 = vector.extract_strided_slice %12 {offsets = [0, 32], sizes = [2, 32], strides = [1, 1]} : vector<2x128xf32> to vector<2x32xf32>
    %20 = arith.negf %19 : vector<2x32xf32>
    %21 = math.exp %20 : vector<2x32xf32>
    %cst_10 = arith.constant 1.000000e+00 : f32
    %22 = vector.broadcast %cst_10 : f32 to vector<2x32xf32>
    %23 = arith.addf %22, %21 : vector<2x32xf32>
    %24 = arith.divf %22, %23 : vector<2x32xf32>
    %25 = vector.extract_strided_slice %12 {offsets = [0, 64], sizes = [2, 32], strides = [1, 1]} : vector<2x128xf32> to vector<2x32xf32>
    %26 = math.tanh %25 : vector<2x32xf32>
    %27 = vector.extract_strided_slice %12 {offsets = [0, 96], sizes = [2, 32], strides = [1, 1]} : vector<2x128xf32> to vector<2x32xf32>
    %28 = arith.negf %27 : vector<2x32xf32>
    %29 = math.exp %28 : vector<2x32xf32>
    %cst_11 = arith.constant 1.000000e+00 : f32
    %30 = vector.broadcast %cst_11 : f32 to vector<2x32xf32>
    %31 = arith.addf %30, %29 : vector<2x32xf32>
    %32 = arith.divf %30, %31 : vector<2x32xf32>
    %33 = arith.mulf %24, %5 : vector<2x32xf32>
    %34 = arith.mulf %18, %26 : vector<2x32xf32>
    %35 = arith.addf %33, %34 : vector<2x32xf32>
    %36 = math.tanh %35 : vector<2x32xf32>
    %37 = arith.mulf %32, %36 : vector<2x32xf32>
    %38 = arith.index_cast %c0_i32_6 : i32 to index
    %c0_12 = arith.constant 0 : index
    %c0_13 = arith.constant 0 : index
    %39 = vector.load %arg4[%38, %c0_12, %c0_13] : memref<8x2x32xf32, #tpu.memory_space<vmem>>, vector<1x2x32xf32>
    %40 = vector.shape_cast %39 : vector<1x2x32xf32> to vector<2x32xf32>
    %41 = vector.shape_cast %37 : vector<2x32xf32> to vector<1x2x32xf32>
    tpu.vector_store %arg4[%38, %c0_12, %c0_13], %41 {strides = array<i32>} : memref<8x2x32xf32, #tpu.memory_space<vmem>>, vector<1x2x32xf32>,
    %c1_i32 = arith.constant 1 : i32
    %42 = arith.index_cast %c1_i32 : i32 to index
    %c0_14 = arith.constant 0 : index
    %c0_15 = arith.constant 0 : index
    %43 = vector.load %arg2[%42, %c0_14, %c0_15] : memref<8x2x128xbf16, #tpu.memory_space<vmem>>, vector<1x2x128xbf16>
    %44 = vector.shape_cast %43 : vector<1x2x128xbf16> to vector<2x128xbf16>
    %45 = arith.extf %44 : vector<2x128xbf16> to vector<2x128xf32>
    %46 = arith.truncf %37 : vector<2x32xf32> to vector<2x32xbf16>
    %cst_16 = arith.constant dense<0.000000e+00> : vector<2x128xf32>
    %47 = tpu.matmul %46, %3, %cst_16 {dimension_numbers = #tpu.dot_dimension_numbers<[1], [0], [0], [1], [0, 0, 1, 1], [], []>} : vector<2x32xbf16>, vector<32x128xbf16>, vector<2x128xf32> -> vector<2x128xf32>
    %48 = arith.addf %45, %47 : vector<2x128xf32>
    %49 = vector.extract_strided_slice %48 {offsets = [0, 0], sizes = [2, 32], strides = [1, 1]} : vector<2x128xf32> to vector<2x32xf32>
    %50 = arith.negf %49 : vector<2x32xf32>
    %51 = math.exp %50 : vector<2x32xf32>
    %cst_17 = arith.constant 1.000000e+00 : f32
    %52 = vector.broadcast %cst_17 : f32 to vector<2x32xf32>
    %53 = arith.addf %52, %51 : vector<2x32xf32>
    %54 = arith.divf %52, %53 : vector<2x32xf32>
    %55 = vector.extract_strided_slice %48 {offsets = [0, 32], sizes = [2, 32], strides = [1, 1]} : vector<2x128xf32> to vector<2x32xf32>
    %56 = arith.negf %55 : vector<2x32xf32>
    %57 = math.exp %56 : vector<2x32xf32>
    %cst_18 = arith.constant 1.000000e+00 : f32
    %58 = vector.broadcast %cst_18 : f32 to vector<2x32xf32>
    %59 = arith.addf %58, %57 : vector<2x32xf32>
    %60 = arith.divf %58, %59 : vector<2x32xf32>
    %61 = vector.extract_strided_slice %48 {offsets = [0, 64], sizes = [2, 32], strides = [1, 1]} : vector<2x128xf32> to vector<2x32xf32>
    %62 = math.tanh %61 : vector<2x32xf32>
    %63 = vector.extract_strided_slice %48 {offsets = [0, 96], sizes = [2, 32], strides = [1, 1]} : vector<2x128xf32> to vector<2x32xf32>
    %64 = arith.negf %63 : vector<2x32xf32>
    %65 = math.exp %64 : vector<2x32xf32>
    %cst_19 = arith.constant 1.000000e+00 : f32
    %66 = vector.broadcast %cst_19 : f32 to vector<2x32xf32>
    %67 = arith.addf %66, %65 : vector<2x32xf32>
    %68 = arith.divf %66, %67 : vector<2x32xf32>
    %69 = arith.mulf %60, %35 : vector<2x32xf32>
    %70 = arith.mulf %54, %62 : vector<2x32xf32>
    %71 = arith.addf %69, %70 : vector<2x32xf32>
    %72 = math.tanh %71 : vector<2x32xf32>
    %73 = arith.mulf %68, %72 : vector<2x32xf32>
    %74 = arith.index_cast %c1_i32 : i32 to index
    %c0_20 = arith.constant 0 : index
    %c0_21 = arith.constant 0 : index
    %75 = vector.load %arg4[%74, %c0_20, %c0_21] : memref<8x2x32xf32, #tpu.memory_space<vmem>>, vector<1x2x32xf32>
    %76 = vector.shape_cast %75 : vector<1x2x32xf32> to vector<2x32xf32>
    %77 = vector.shape_cast %73 : vector<2x32xf32> to vector<1x2x32xf32>
    tpu.vector_store %arg4[%74, %c0_20, %c0_21], %77 {strides = array<i32>} : memref<8x2x32xf32, #tpu.memory_space<vmem>>, vector<1x2x32xf32>,
    %c2_i32 = arith.constant 2 : i32
    %78 = arith.index_cast %c2_i32 : i32 to index
    %c0_22 = arith.constant 0 : index
    %c0_23 = arith.constant 0 : index
    %79 = vector.load %arg2[%78, %c0_22, %c0_23] : memref<8x2x128xbf16, #tpu.memory_space<vmem>>, vector<1x2x128xbf16>
    %80 = vector.shape_cast %79 : vector<1x2x128xbf16> to vector<2x128xbf16>
    %81 = arith.extf %80 : vector<2x128xbf16> to vector<2x128xf32>
    %82 = arith.truncf %73 : vector<2x32xf32> to vector<2x32xbf16>
    %cst_24 = arith.constant dense<0.000000e+00> : vector<2x128xf32>
    %83 = tpu.matmul %82, %3, %cst_24 {dimension_numbers = #tpu.dot_dimension_numbers<[1], [0], [0], [1], [0, 0, 1, 1], [], []>} : vector<2x32xbf16>, vector<32x128xbf16>, vector<2x128xf32> -> vector<2x128xf32>
    %84 = arith.addf %81, %83 : vector<2x128xf32>
    %85 = vector.extract_strided_slice %84 {offsets = [0, 0], sizes = [2, 32], strides = [1, 1]} : vector<2x128xf32> to vector<2x32xf32>
    %86 = arith.negf %85 : vector<2x32xf32>
    %87 = math.exp %86 : vector<2x32xf32>
    %cst_25 = arith.constant 1.000000e+00 : f32
    %88 = vector.broadcast %cst_25 : f32 to vector<2x32xf32>
    %89 = arith.addf %88, %87 : vector<2x32xf32>
    %90 = arith.divf %88, %89 : vector<2x32xf32>
    %91 = vector.extract_strided_slice %84 {offsets = [0, 32], sizes = [2, 32], strides = [1, 1]} : vector<2x128xf32> to vector<2x32xf32>
    %92 = arith.negf %91 : vector<2x32xf32>
    %93 = math.exp %92 : vector<2x32xf32>
    %cst_26 = arith.constant 1.000000e+00 : f32
    %94 = vector.broadcast %cst_26 : f32 to vector<2x32xf32>
    %95 = arith.addf %94, %93 : vector<2x32xf32>
    %96 = arith.divf %94, %95 : vector<2x32xf32>
    %97 = vector.extract_strided_slice %84 {offsets = [0, 64], sizes = [2, 32], strides = [1, 1]} : vector<2x128xf32> to vector<2x32xf32>
    %98 = math.tanh %97 : vector<2x32xf32>
    %99 = vector.extract_strided_slice %84 {offsets = [0, 96], sizes = [2, 32], strides = [1, 1]} : vector<2x128xf32> to vector<2x32xf32>
    %100 = arith.negf %99 : vector<2x32xf32>
    %101 = math.exp %100 : vector<2x32xf32>
    %cst_27 = arith.constant 1.000000e+00 : f32
    %102 = vector.broadcast %cst_27 : f32 to vector<2x32xf32>
    %103 = arith.addf %102, %101 : vector<2x32xf32>
    %104 = arith.divf %102, %103 : vector<2x32xf32>
    %105 = arith.mulf %96, %71 : vector<2x32xf32>
    %106 = arith.mulf %90, %98 : vector<2x32xf32>
    %107 = arith.addf %105, %106 : vector<2x32xf32>
    %108 = math.tanh %107 : vector<2x32xf32>
    %109 = arith.mulf %104, %108 : vector<2x32xf32>
    %110 = arith.index_cast %c2_i32 : i32 to index
    %c0_28 = arith.constant 0 : index
    %c0_29 = arith.constant 0 : index
    %111 = vector.load %arg4[%110, %c0_28, %c0_29] : memref<8x2x32xf32, #tpu.memory_space<vmem>>, vector<1x2x32xf32>
    %112 = vector.shape_cast %111 : vector<1x2x32xf32> to vector<2x32xf32>
    %113 = vector.shape_cast %109 : vector<2x32xf32> to vector<1x2x32xf32>
    tpu.vector_store %arg4[%110, %c0_28, %c0_29], %113 {strides = array<i32>} : memref<8x2x32xf32, #tpu.memory_space<vmem>>, vector<1x2x32xf32>,
    %c3_i32 = arith.constant 3 : i32
    %114 = arith.index_cast %c3_i32 : i32 to index
    %c0_30 = arith.constant 0 : index
    %c0_31 = arith.constant 0 : index
    %115 = vector.load %arg2[%114, %c0_30, %c0_31] : memref<8x2x128xbf16, #tpu.memory_space<vmem>>, vector<1x2x128xbf16>
    %116 = vector.shape_cast %115 : vector<1x2x128xbf16> to vector<2x128xbf16>
    %117 = arith.extf %116 : vector<2x128xbf16> to vector<2x128xf32>
    %118 = arith.truncf %109 : vector<2x32xf32> to vector<2x32xbf16>
    %cst_32 = arith.constant dense<0.000000e+00> : vector<2x128xf32>
    %119 = tpu.matmul %118, %3, %cst_32 {dimension_numbers = #tpu.dot_dimension_numbers<[1], [0], [0], [1], [0, 0, 1, 1], [], []>} : vector<2x32xbf16>, vector<32x128xbf16>, vector<2x128xf32> -> vector<2x128xf32>
    %120 = arith.addf %117, %119 : vector<2x128xf32>
    %121 = vector.extract_strided_slice %120 {offsets = [0, 0], sizes = [2, 32], strides = [1, 1]} : vector<2x128xf32> to vector<2x32xf32>
    %122 = arith.negf %121 : vector<2x32xf32>
    %123 = math.exp %122 : vector<2x32xf32>
    %cst_33 = arith.constant 1.000000e+00 : f32
    %124 = vector.broadcast %cst_33 : f32 to vector<2x32xf32>
    %125 = arith.addf %124, %123 : vector<2x32xf32>
    %126 = arith.divf %124, %125 : vector<2x32xf32>
    %127 = vector.extract_strided_slice %120 {offsets = [0, 32], sizes = [2, 32], strides = [1, 1]} : vector<2x128xf32> to vector<2x32xf32>
    %128 = arith.negf %127 : vector<2x32xf32>
    %129 = math.exp %128 : vector<2x32xf32>
    %cst_34 = arith.constant 1.000000e+00 : f32
    %130 = vector.broadcast %cst_34 : f32 to vector<2x32xf32>
    %131 = arith.addf %130, %129 : vector<2x32xf32>
    %132 = arith.divf %130, %131 : vector<2x32xf32>
    %133 = vector.extract_strided_slice %120 {offsets = [0, 64], sizes = [2, 32], strides = [1, 1]} : vector<2x128xf32> to vector<2x32xf32>
    %134 = math.tanh %133 : vector<2x32xf32>
    %135 = vector.extract_strided_slice %120 {offsets = [0, 96], sizes = [2, 32], strides = [1, 1]} : vector<2x128xf32> to vector<2x32xf32>
    %136 = arith.negf %135 : vector<2x32xf32>
    %137 = math.exp %136 : vector<2x32xf32>
    %cst_35 = arith.constant 1.000000e+00 : f32
    %138 = vector.broadcast %cst_35 : f32 to vector<2x32xf32>
    %139 = arith.addf %138, %137 : vector<2x32xf32>
    %140 = arith.divf %138, %139 : vector<2x32xf32>
    %141 = arith.mulf %132, %107 : vector<2x32xf32>
    %142 = arith.mulf %126, %134 : vector<2x32xf32>
    %143 = arith.addf %141, %142 : vector<2x32xf32>
    %144 = math.tanh %143 : vector<2x32xf32>
    %145 = arith.mulf %140, %144 : vector<2x32xf32>
    %146 = arith.index_cast %c3_i32 : i32 to index
    %c0_36 = arith.constant 0 : index
    %c0_37 = arith.constant 0 : index
    %147 = vector.load %arg4[%146, %c0_36, %c0_37] : memref<8x2x32xf32, #tpu.memory_space<vmem>>, vector<1x2x32xf32>
    %148 = vector.shape_cast %147 : vector<1x2x32xf32> to vector<2x32xf32>
    %149 = vector.shape_cast %145 : vector<2x32xf32> to vector<1x2x32xf32>
    tpu.vector_store %arg4[%146, %c0_36, %c0_37], %149 {strides = array<i32>} : memref<8x2x32xf32, #tpu.memory_space<vmem>>, vector<1x2x32xf32>,
    %c4_i32 = arith.constant 4 : i32
    %150 = arith.index_cast %c4_i32 : i32 to index
    %c0_38 = arith.constant 0 : index
    %c0_39 = arith.constant 0 : index
    %151 = vector.load %arg2[%150, %c0_38, %c0_39] : memref<8x2x128xbf16, #tpu.memory_space<vmem>>, vector<1x2x128xbf16>
    %152 = vector.shape_cast %151 : vector<1x2x128xbf16> to vector<2x128xbf16>
    %153 = arith.extf %152 : vector<2x128xbf16> to vector<2x128xf32>
    %154 = arith.truncf %145 : vector<2x32xf32> to vector<2x32xbf16>
    %cst_40 = arith.constant dense<0.000000e+00> : vector<2x128xf32>
    %155 = tpu.matmul %154, %3, %cst_40 {dimension_numbers = #tpu.dot_dimension_numbers<[1], [0], [0], [1], [0, 0, 1, 1], [], []>} : vector<2x32xbf16>, vector<32x128xbf16>, vector<2x128xf32> -> vector<2x128xf32>
    %156 = arith.addf %153, %155 : vector<2x128xf32>
    %157 = vector.extract_strided_slice %156 {offsets = [0, 0], sizes = [2, 32], strides = [1, 1]} : vector<2x128xf32> to vector<2x32xf32>
    %158 = arith.negf %157 : vector<2x32xf32>
    %159 = math.exp %158 : vector<2x32xf32>
    %cst_41 = arith.constant 1.000000e+00 : f32
    %160 = vector.broadcast %cst_41 : f32 to vector<2x32xf32>
    %161 = arith.addf %160, %159 : vector<2x32xf32>
    %162 = arith.divf %160, %161 : vector<2x32xf32>
    %163 = vector.extract_strided_slice %156 {offsets = [0, 32], sizes = [2, 32], strides = [1, 1]} : vector<2x128xf32> to vector<2x32xf32>
    %164 = arith.negf %163 : vector<2x32xf32>
    %165 = math.exp %164 : vector<2x32xf32>
    %cst_42 = arith.constant 1.000000e+00 : f32
    %166 = vector.broadcast %cst_42 : f32 to vector<2x32xf32>
    %167 = arith.addf %166, %165 : vector<2x32xf32>
    %168 = arith.divf %166, %167 : vector<2x32xf32>
    %169 = vector.extract_strided_slice %156 {offsets = [0, 64], sizes = [2, 32], strides = [1, 1]} : vector<2x128xf32> to vector<2x32xf32>
    %170 = math.tanh %169 : vector<2x32xf32>
    %171 = vector.extract_strided_slice %156 {offsets = [0, 96], sizes = [2, 32], strides = [1, 1]} : vector<2x128xf32> to vector<2x32xf32>
    %172 = arith.negf %171 : vector<2x32xf32>
    %173 = math.exp %172 : vector<2x32xf32>
    %cst_43 = arith.constant 1.000000e+00 : f32
    %174 = vector.broadcast %cst_43 : f32 to vector<2x32xf32>
    %175 = arith.addf %174, %173 : vector<2x32xf32>
    %176 = arith.divf %174, %175 : vector<2x32xf32>
    %177 = arith.mulf %168, %143 : vector<2x32xf32>
    %178 = arith.mulf %162, %170 : vector<2x32xf32>
    %179 = arith.addf %177, %178 : vector<2x32xf32>
    %180 = math.tanh %179 : vector<2x32xf32>
    %181 = arith.mulf %176, %180 : vector<2x32xf32>
    %182 = arith.index_cast %c4_i32 : i32 to index
    %c0_44 = arith.constant 0 : index
    %c0_45 = arith.constant 0 : index
    %183 = vector.load %arg4[%182, %c0_44, %c0_45] : memref<8x2x32xf32, #tpu.memory_space<vmem>>, vector<1x2x32xf32>
    %184 = vector.shape_cast %183 : vector<1x2x32xf32> to vector<2x32xf32>
    %185 = vector.shape_cast %181 : vector<2x32xf32> to vector<1x2x32xf32>
    tpu.vector_store %arg4[%182, %c0_44, %c0_45], %185 {strides = array<i32>} : memref<8x2x32xf32, #tpu.memory_space<vmem>>, vector<1x2x32xf32>,
    %c5_i32 = arith.constant 5 : i32
    %186 = arith.index_cast %c5_i32 : i32 to index
    %c0_46 = arith.constant 0 : index
    %c0_47 = arith.constant 0 : index
    %187 = vector.load %arg2[%186, %c0_46, %c0_47] : memref<8x2x128xbf16, #tpu.memory_space<vmem>>, vector<1x2x128xbf16>
    %188 = vector.shape_cast %187 : vector<1x2x128xbf16> to vector<2x128xbf16>
    %189 = arith.extf %188 : vector<2x128xbf16> to vector<2x128xf32>
    %190 = arith.truncf %181 : vector<2x32xf32> to vector<2x32xbf16>
    %cst_48 = arith.constant dense<0.000000e+00> : vector<2x128xf32>
    %191 = tpu.matmul %190, %3, %cst_48 {dimension_numbers = #tpu.dot_dimension_numbers<[1], [0], [0], [1], [0, 0, 1, 1], [], []>} : vector<2x32xbf16>, vector<32x128xbf16>, vector<2x128xf32> -> vector<2x128xf32>
    %192 = arith.addf %189, %191 : vector<2x128xf32>
    %193 = vector.extract_strided_slice %192 {offsets = [0, 0], sizes = [2, 32], strides = [1, 1]} : vector<2x128xf32> to vector<2x32xf32>
    %194 = arith.negf %193 : vector<2x32xf32>
    %195 = math.exp %194 : vector<2x32xf32>
    %cst_49 = arith.constant 1.000000e+00 : f32
    %196 = vector.broadcast %cst_49 : f32 to vector<2x32xf32>
    %197 = arith.addf %196, %195 : vector<2x32xf32>
    %198 = arith.divf %196, %197 : vector<2x32xf32>
    %199 = vector.extract_strided_slice %192 {offsets = [0, 32], sizes = [2, 32], strides = [1, 1]} : vector<2x128xf32> to vector<2x32xf32>
    %200 = arith.negf %199 : vector<2x32xf32>
    %201 = math.exp %200 : vector<2x32xf32>
    %cst_50 = arith.constant 1.000000e+00 : f32
    %202 = vector.broadcast %cst_50 : f32 to vector<2x32xf32>
    %203 = arith.addf %202, %201 : vector<2x32xf32>
    %204 = arith.divf %202, %203 : vector<2x32xf32>
    %205 = vector.extract_strided_slice %192 {offsets = [0, 64], sizes = [2, 32], strides = [1, 1]} : vector<2x128xf32> to vector<2x32xf32>
    %206 = math.tanh %205 : vector<2x32xf32>
    %207 = vector.extract_strided_slice %192 {offsets = [0, 96], sizes = [2, 32], strides = [1, 1]} : vector<2x128xf32> to vector<2x32xf32>
    %208 = arith.negf %207 : vector<2x32xf32>
    %209 = math.exp %208 : vector<2x32xf32>
    %cst_51 = arith.constant 1.000000e+00 : f32
    %210 = vector.broadcast %cst_51 : f32 to vector<2x32xf32>
    %211 = arith.addf %210, %209 : vector<2x32xf32>
    %212 = arith.divf %210, %211 : vector<2x32xf32>
    %213 = arith.mulf %204, %179 : vector<2x32xf32>
    %214 = arith.mulf %198, %206 : vector<2x32xf32>
    %215 = arith.addf %213, %214 : vector<2x32xf32>
    %216 = math.tanh %215 : vector<2x32xf32>
    %217 = arith.mulf %212, %216 : vector<2x32xf32>
    %218 = arith.index_cast %c5_i32 : i32 to index
    %c0_52 = arith.constant 0 : index
    %c0_53 = arith.constant 0 : index
    %219 = vector.load %arg4[%218, %c0_52, %c0_53] : memref<8x2x32xf32, #tpu.memory_space<vmem>>, vector<1x2x32xf32>
    %220 = vector.shape_cast %219 : vector<1x2x32xf32> to vector<2x32xf32>
    %221 = vector.shape_cast %217 : vector<2x32xf32> to vector<1x2x32xf32>
    tpu.vector_store %arg4[%218, %c0_52, %c0_53], %221 {strides = array<i32>} : memref<8x2x32xf32, #tpu.memory_space<vmem>>, vector<1x2x32xf32>,
    %c6_i32 = arith.constant 6 : i32
    %222 = arith.index_cast %c6_i32 : i32 to index
    %c0_54 = arith.constant 0 : index
    %c0_55 = arith.constant 0 : index
    %223 = vector.load %arg2[%222, %c0_54, %c0_55] : memref<8x2x128xbf16, #tpu.memory_space<vmem>>, vector<1x2x128xbf16>
    %224 = vector.shape_cast %223 : vector<1x2x128xbf16> to vector<2x128xbf16>
    %225 = arith.extf %224 : vector<2x128xbf16> to vector<2x128xf32>
    %226 = arith.truncf %217 : vector<2x32xf32> to vector<2x32xbf16>
    %cst_56 = arith.constant dense<0.000000e+00> : vector<2x128xf32>
    %227 = tpu.matmul %226, %3, %cst_56 {dimension_numbers = #tpu.dot_dimension_numbers<[1], [0], [0], [1], [0, 0, 1, 1], [], []>} : vector<2x32xbf16>, vector<32x128xbf16>, vector<2x128xf32> -> vector<2x128xf32>
    %228 = arith.addf %225, %227 : vector<2x128xf32>
    %229 = vector.extract_strided_slice %228 {offsets = [0, 0], sizes = [2, 32], strides = [1, 1]} : vector<2x128xf32> to vector<2x32xf32>
    %230 = arith.negf %229 : vector<2x32xf32>
    %231 = math.exp %230 : vector<2x32xf32>
    %cst_57 = arith.constant 1.000000e+00 : f32
    %232 = vector.broadcast %cst_57 : f32 to vector<2x32xf32>
    %233 = arith.addf %232, %231 : vector<2x32xf32>
    %234 = arith.divf %232, %233 : vector<2x32xf32>
    %235 = vector.extract_strided_slice %228 {offsets = [0, 32], sizes = [2, 32], strides = [1, 1]} : vector<2x128xf32> to vector<2x32xf32>
    %236 = arith.negf %235 : vector<2x32xf32>
    %237 = math.exp %236 : vector<2x32xf32>
    %cst_58 = arith.constant 1.000000e+00 : f32
    %238 = vector.broadcast %cst_58 : f32 to vector<2x32xf32>
    %239 = arith.addf %238, %237 : vector<2x32xf32>
    %240 = arith.divf %238, %239 : vector<2x32xf32>
    %241 = vector.extract_strided_slice %228 {offsets = [0, 64], sizes = [2, 32], strides = [1, 1]} : vector<2x128xf32> to vector<2x32xf32>
    %242 = math.tanh %241 : vector<2x32xf32>
    %243 = vector.extract_strided_slice %228 {offsets = [0, 96], sizes = [2, 32], strides = [1, 1]} : vector<2x128xf32> to vector<2x32xf32>
    %244 = arith.negf %243 : vector<2x32xf32>
    %245 = math.exp %244 : vector<2x32xf32>
    %cst_59 = arith.constant 1.000000e+00 : f32
    %246 = vector.broadcast %cst_59 : f32 to vector<2x32xf32>
    %247 = arith.addf %246, %245 : vector<2x32xf32>
    %248 = arith.divf %246, %247 : vector<2x32xf32>
    %249 = arith.mulf %240, %215 : vector<2x32xf32>
    %250 = arith.mulf %234, %242 : vector<2x32xf32>
    %251 = arith.addf %249, %250 : vector<2x32xf32>
    %252 = math.tanh %251 : vector<2x32xf32>
    %253 = arith.mulf %248, %252 : vector<2x32xf32>
    %254 = arith.index_cast %c6_i32 : i32 to index
    %c0_60 = arith.constant 0 : index
    %c0_61 = arith.constant 0 : index
    %255 = vector.load %arg4[%254, %c0_60, %c0_61] : memref<8x2x32xf32, #tpu.memory_space<vmem>>, vector<1x2x32xf32>
    %256 = vector.shape_cast %255 : vector<1x2x32xf32> to vector<2x32xf32>
    %257 = vector.shape_cast %253 : vector<2x32xf32> to vector<1x2x32xf32>
    tpu.vector_store %arg4[%254, %c0_60, %c0_61], %257 {strides = array<i32>} : memref<8x2x32xf32, #tpu.memory_space<vmem>>, vector<1x2x32xf32>,
    %c7_i32 = arith.constant 7 : i32
    %258 = arith.index_cast %c7_i32 : i32 to index
    %c0_62 = arith.constant 0 : index
    %c0_63 = arith.constant 0 : index
    %259 = vector.load %arg2[%258, %c0_62, %c0_63] : memref<8x2x128xbf16, #tpu.memory_space<vmem>>, vector<1x2x128xbf16>
    %260 = vector.shape_cast %259 : vector<1x2x128xbf16> to vector<2x128xbf16>
    %261 = arith.extf %260 : vector<2x128xbf16> to vector<2x128xf32>
    %262 = arith.truncf %253 : vector<2x32xf32> to vector<2x32xbf16>
    %cst_64 = arith.constant dense<0.000000e+00> : vector<2x128xf32>
    %263 = tpu.matmul %262, %3, %cst_64 {dimension_numbers = #tpu.dot_dimension_numbers<[1], [0], [0], [1], [0, 0, 1, 1], [], []>} : vector<2x32xbf16>, vector<32x128xbf16>, vector<2x128xf32> -> vector<2x128xf32>
    %264 = arith.addf %261, %263 : vector<2x128xf32>
    %265 = vector.extract_strided_slice %264 {offsets = [0, 0], sizes = [2, 32], strides = [1, 1]} : vector<2x128xf32> to vector<2x32xf32>
    %266 = arith.negf %265 : vector<2x32xf32>
    %267 = math.exp %266 : vector<2x32xf32>
    %cst_65 = arith.constant 1.000000e+00 : f32
    %268 = vector.broadcast %cst_65 : f32 to vector<2x32xf32>
    %269 = arith.addf %268, %267 : vector<2x32xf32>
    %270 = arith.divf %268, %269 : vector<2x32xf32>
    %271 = vector.extract_strided_slice %264 {offsets = [0, 32], sizes = [2, 32], strides = [1, 1]} : vector<2x128xf32> to vector<2x32xf32>
    %272 = arith.negf %271 : vector<2x32xf32>
    %273 = math.exp %272 : vector<2x32xf32>
    %cst_66 = arith.constant 1.000000e+00 : f32
    %274 = vector.broadcast %cst_66 : f32 to vector<2x32xf32>
    %275 = arith.addf %274, %273 : vector<2x32xf32>
    %276 = arith.divf %274, %275 : vector<2x32xf32>
    %277 = vector.extract_strided_slice %264 {offsets = [0, 64], sizes = [2, 32], strides = [1, 1]} : vector<2x128xf32> to vector<2x32xf32>
    %278 = math.tanh %277 : vector<2x32xf32>
    %279 = vector.extract_strided_slice %264 {offsets = [0, 96], sizes = [2, 32], strides = [1, 1]} : vector<2x128xf32> to vector<2x32xf32>
    %280 = arith.negf %279 : vector<2x32xf32>
    %281 = math.exp %280 : vector<2x32xf32>
    %cst_67 = arith.constant 1.000000e+00 : f32
    %282 = vector.broadcast %cst_67 : f32 to vector<2x32xf32>
    %283 = arith.addf %282, %281 : vector<2x32xf32>
    %284 = arith.divf %282, %283 : vector<2x32xf32>
    %285 = arith.mulf %276, %251 : vector<2x32xf32>
    %286 = arith.mulf %270, %278 : vector<2x32xf32>
    %287 = arith.addf %285, %286 : vector<2x32xf32>
    %288 = math.tanh %287 : vector<2x32xf32>
    %289 = arith.mulf %284, %288 : vector<2x32xf32>
    %290 = arith.index_cast %c7_i32 : i32 to index
    %c0_68 = arith.constant 0 : index
    %c0_69 = arith.constant 0 : index
    %291 = vector.load %arg4[%290, %c0_68, %c0_69] : memref<8x2x32xf32, #tpu.memory_space<vmem>>, vector<1x2x32xf32>
    %292 = vector.shape_cast %291 : vector<1x2x32xf32> to vector<2x32xf32>
    %293 = vector.shape_cast %289 : vector<2x32xf32> to vector<1x2x32xf32>
    tpu.vector_store %arg4[%290, %c0_68, %c0_69], %293 {strides = array<i32>} : memref<8x2x32xf32, #tpu.memory_space<vmem>>, vector<1x2x32xf32>,
    %c8_i32 = arith.constant 8 : i32
    %c0_70 = arith.constant 0 : index
    %c0_71 = arith.constant 0 : index
    %294 = vector.load %arg5[%c0_70, %c0_71] : memref<2x32xf32, #tpu.memory_space<vmem>>, vector<2x32xf32>
    tpu.vector_store %arg5[%c0_70, %c0_71], %289 {strides = array<i32>} : memref<2x32xf32, #tpu.memory_space<vmem>>, vector<2x32xf32>,
    %c0_72 = arith.constant 0 : index
    %c0_73 = arith.constant 0 : index
    %295 = vector.load %arg6[%c0_72, %c0_73] : memref<2x32xf32, #tpu.memory_space<vmem>>, vector<2x32xf32>
    tpu.vector_store %arg6[%c0_72, %c0_73], %287 {strides = array<i32>} : memref<2x32xf32, #tpu.memory_space<vmem>>, vector<2x32xf32>,
    return
  }
  func.func @transform_0(%arg0: i32, %arg1: i32) -> (i32, i32, i32) {
    %c0_i32 = arith.constant 0 : i32
    %c0_i32_0 = arith.constant 0 : i32
    return %arg1, %arg0, %c0_i32 : i32, i32, i32
  }
  func.func @transform_1(%arg0: i32, %arg1: i32) -> (i32, i32) {
    %c0_i32 = arith.constant 0 : i32
    %c0_i32_0 = arith.constant 0 : i32
    %c0_i32_1 = arith.constant 0 : i32
    return %c0_i32, %c0_i32_0 : i32, i32
  }
  func.func @transform_2(%arg0: i32, %arg1: i32) -> (i32, i32, i32) {
    %c0_i32 = arith.constant 0 : i32
    %c0_i32_0 = arith.constant 0 : i32
    return %arg1, %arg0, %c0_i32 : i32, i32, i32
  }
}

</mosaic_0001>

<bundles_post_ra>
// kernel: lstm_lm_forward.5
= control target key start
LH: loop header
LB: loop body
LE: loop exit
PB: predicated region body
PF: predicated region fallthrough
CT: control target
= control target key end

     0   :  { %s873_s12 = smov 0   ;;  %s875_s13 = smov 0   ;;  %s1125_s0 = inlined_call_operand.vmem [shape: f32[2,128,32], index: 0, kind: input, shape index: {}]   ;;  %s1126_s1 = inlined_call_operand.vmem [shape: f32[128,32], index: 1, kind: input, shape index: {}]   ;;  %s1127_s2 = inlined_call_operand.vmem [shape: f32[128,1], index: 2, kind: input, shape index: {}]   ;;  %s1128_s3 = inlined_call_operand.vmem [shape: f32[2,128,128], index: 3, kind: output, shape index: {}]  }
   0x1   :  { %s877_s14 = smov 0  }
   0x2 LB: > { %s28_s15 = sadd.s32 1, %s846_s13  ;;  %p711_p0 = scmp.ge.s32.totalorder %s850_s14, 1  ;;  %s850_s14 = sphi %s877_s14, %s13_s14   ;;  %s846_s13 = sphi %s875_s13, %s1130_s13   ;;  %s842_s12 = sphi %s873_s12, %s1129_s12  }
   0x3   : > { %p30_p1 = scmp.ge.s32.totalorder %s28_s15, 2  ;;  %p189_p2 = scmp.lt.s32.totalorder %s850_s14, 3 }
   0x5   : > { %s1132_s15 = smov (%p30_p1, %s28_s15), 0  ;;  %p190_p3 = pnand %p711_p0, %p189_p2 }
   0x6   : > { %p235_p4 = scmp.lt.s32.totalorder (!%p190_p3), %s842_s12, 1 }
   0x7   : > { %193 = sbr.rel (%p190_p3) target bundleno = 240 (0xf0), region = 32 }
   0xc   : > { %v301_v0 = vld [vmem:[%s1127_s2] sm:$0xff]  ;;  %v852_v1 = vmov 0   ;;  %s1134_s12 = smov (!%p235_p4, %s842_s12), 1  ;;  %vm397_vm0 = vcmask 261120   ;;  %v302_v3 = vld [vmem:[%s1127_s2 + $0x8] sm:$0xff]  ;;  %v303_v6 = vld [vmem:[%s1127_s2 + $0x10] sm:$0xff] }
   0xd   : > { %825 = vset.pattern.permute.xlu0 %v852_v1  ;;  %826 = vset.pattern.permute.xlu1 %v852_v1  ;;  %s750_s18 = sshll.u32 %s1134_s12, 7  ;;  %v307_v7 = vld [vmem:[%s1127_s2 + $0x30] sm:$0xff]  ;;  %v304_v10 = vld [vmem:[%s1127_s2 + $0x18] sm:$0xff]  ;;  %v310_v11 = vld [vmem:[%s1127_s2 + $0x48] sm:$0xff] }
   0xe   : > { %319 = vperm.xlu0 %825, %v301_v0   ;;  %827 = vset.pattern.permute.xlu2 %v852_v1  ;;  %s902_s21 = scalar_lea.vmem %s1125_s0, %s750_s18  ;;  %v308_v14 = vld [vmem:[%s1127_s2 + $0x38] sm:$0xff]  ;;  %v313_v15 = vld [vmem:[%s1127_s2 + $0x60] sm:$0xff]  ;;  %v311_v19 = vld [vmem:[%s1127_s2 + $0x50] sm:$0xff]  ;;  %s1098_s20 = scalar_lea.vmem %s1128_s3, %s750_s18 }
   0xf   : > { %v300_v2 = vld [vmem:[%s902_s21 + $0x78] sm:$0xff]  ;;  %v299_v4 = vld [vmem:[%s902_s21 + $0x70] sm:$0xff]  ;;  %v298_v5 = vld [vmem:[%s902_s21 + $0x68] sm:$0xff]  ;;  %329 = vperm.xlu1 %826, %v303_v6  }
  0x10   : > { %716 = vmatpush.xpose.msk.msra.mxu0 %vm397_vm0, %v300_v2  ;;  %752 = vmatpush.xpose.msk.msra.mxu1 %vm397_vm0, %v300_v2  ;;  %v297_v8 = vld [vmem:[%s902_s21 + $0x60] sm:$0xff]  ;;  %v296_v9 = vld [vmem:[%s902_s21 + $0x58] sm:$0xff]  ;;  %v295_v12 = vld [vmem:[%s902_s21 + $0x50] sm:$0xff] }
  0x11   : > { %753 = vmatpush.xpose.msk.msra.mxu2 %vm397_vm0, %v300_v2  ;;  %754 = vmatpush.xpose.msk.msra.mxu3 %vm397_vm0, %v300_v2  ;;  %v294_v13 = vld [vmem:[%s902_s21 + $0x48] sm:$0xff]  ;;  %v293_v16 = vld [vmem:[%s902_s21 + $0x40] sm:$0xff]  ;;  %v292_v17 = vld [vmem:[%s902_s21 + $0x38] sm:$0xff] }
  0x12   : > { %v305_v18 = vld [vmem:[%s1127_s2 + $0x20] sm:$0xff]  ;;  %v316_v20 = vld [vmem:[%s1127_s2 + $0x78] sm:$0xff]  ;;  %v291_v21 = vld [vmem:[%s902_s21 + $0x30] sm:$0xff] }
  0x13   : > { %339 = vperm.xlu2 %827, %v305_v18   ;;  %v290_v22 = vld [vmem:[%s902_s21 + $0x28] sm:$0xff]  ;;  %v289_v25 = vld [vmem:[%s902_s21 + $0x20] sm:$0xff]  ;;  %v288_v26 = vld [vmem:[%s902_s21 + $0x18] sm:$0xff] }
  0x14   : > { %717 = vmatpush.xpose.msk.msra.mxu0 %vm397_vm0, %v299_v4  ;;  %755 = vmatpush.xpose.msk.msra.mxu1 %vm397_vm0, %v299_v4  ;;  %v306_v23 = vld [vmem:[%s1127_s2 + $0x28] sm:$0xff]  ;;  %v309_v27 = vld [vmem:[%s1127_s2 + $0x40] sm:$0xff]  ;;  %v287_v28 = vld [vmem:[%s902_s21 + $0x10] sm:$0xff] }
  0x15   : > { %756 = vmatpush.xpose.msk.msra.mxu2 %vm397_vm0, %v299_v4  ;;  %757 = vmatpush.xpose.msk.msra.mxu3 %vm397_vm0, %v299_v4  ;;  %v314_v24 = vld [vmem:[%s1127_s2 + $0x68] sm:$0xff]  ;;  %v312_v30 = vld [vmem:[%s1127_s2 + $0x58] sm:$0xff]  ;;  %v285_v31 = vld [vmem:[%s902_s21] sm:$0xff] }
  0x16   : > { %324 = vperm.xlu0 %825, %v302_v3   ;;  %v286_v29 = vld [vmem:[%s902_s21 + $0x8] sm:$0xff]  ;;  %v269_v32 = vld [vmem:[%s1126_s1] sm:$0xff]  ;;  %v315_v36 = vld [vmem:[%s1127_s2 + $0x70] sm:$0xff] }
  0x17   : > { %334 = vperm.xlu1 %826, %v304_v10   ;;  %v273_v33 = vld [vmem:[%s1126_s1 + $0x20] sm:$0xff]  ;;  %v270_v37 = vld [vmem:[%s1126_s1 + $0x8] sm:$0xff]  ;;  %v271_v41 = vld [vmem:[%s1126_s1 + $0x10] sm:$0xff] }
  0x18   : > { %718 = vmatpush.xpose.msk.msra.mxu0 %vm397_vm0, %v298_v5  ;;  %758 = vmatpush.xpose.msk.msra.mxu1 %vm397_vm0, %v298_v5  ;;  %v277_v34 = vld [vmem:[%s1126_s1 + $0x40] sm:$0xff]  ;;  %v274_v38 = vld [vmem:[%s1126_s1 + $0x28] sm:$0xff]  ;;  %v275_v42 = vld [vmem:[%s1126_s1 + $0x30] sm:$0xff] }
  0x19   : > { %759 = vmatpush.xpose.msk.msra.mxu2 %vm397_vm0, %v298_v5  ;;  %760 = vmatpush.xpose.msk.msra.mxu3 %vm397_vm0, %v298_v5  ;;  %v281_v35 = vld [vmem:[%s1126_s1 + $0x60] sm:$0xff]  ;;  %v278_v39 = vld [vmem:[%s1126_s1 + $0x48] sm:$0xff]  ;;  %v279_v43 = vld [vmem:[%s1126_s1 + $0x50] sm:$0xff] }
  0x1a   : > { %v282_v40 = vld [vmem:[%s1126_s1 + $0x68] sm:$0xff]  ;;  %v283_v44 = vld [vmem:[%s1126_s1 + $0x70] sm:$0xff]  ;;  %v272_v45 = vld [vmem:[%s1126_s1 + $0x18] sm:$0xff] }
  0x1b   : > { %344 = vperm.xlu2 %827, %v306_v23   ;;  %v276_v46 = vld [vmem:[%s1126_s1 + $0x38] sm:$0xff] }
  0x1c   : > { %719 = vmatpush.xpose.msk.msra.mxu0 %vm397_vm0, %v297_v8  ;;  %761 = vmatpush.xpose.msk.msra.mxu1 %vm397_vm0, %v297_v8  ;;  %v280_v47 = vld [vmem:[%s1126_s1 + $0x58] sm:$0xff] }
  0x1d   : > { %762 = vmatpush.xpose.msk.msra.mxu2 %vm397_vm0, %v297_v8  ;;  %763 = vmatpush.xpose.msk.msra.mxu3 %vm397_vm0, %v297_v8  ;;  %v284_v48 = vld [vmem:[%s1126_s1 + $0x78] sm:$0xff] }
  0x1e   : > { %349 = vperm.xlu0 %825, %v307_v7  }
  0x1f   : > { %354 = vperm.xlu1 %826, %v308_v14  }
  0x20   : > { %720 = vmatpush.xpose.msk.msra.mxu0 %vm397_vm0, %v296_v9  ;;  %764 = vmatpush.xpose.msk.msra.mxu1 %vm397_vm0, %v296_v9 }
  0x21   : > { %765 = vmatpush.xpose.msk.msra.mxu2 %vm397_vm0, %v296_v9  ;;  %766 = vmatpush.xpose.msk.msra.mxu3 %vm397_vm0, %v296_v9 }
  0x23   : > { %359 = vperm.xlu2 %827, %v309_v27  }
  0x24   : > { %721 = vmatpush.xpose.msk.msra.mxu0 %vm397_vm0, %v295_v12  ;;  %767 = vmatpush.xpose.msk.msra.mxu1 %vm397_vm0, %v295_v12 }
  0x25   : > { %768 = vmatpush.xpose.msk.msra.mxu2 %vm397_vm0, %v295_v12  ;;  %769 = vmatpush.xpose.msk.msra.mxu3 %vm397_vm0, %v295_v12 }
  0x26   : > { %364 = vperm.xlu0 %825, %v310_v11  }
  0x27   : > { %369 = vperm.xlu1 %826, %v311_v19  }
  0x28   : > { %722 = vmatpush.xpose.msk.msra.mxu0 %vm397_vm0, %v294_v13  ;;  %770 = vmatpush.xpose.msk.msra.mxu1 %vm397_vm0, %v294_v13 }
  0x29   : > { %771 = vmatpush.xpose.msk.msra.mxu2 %vm397_vm0, %v294_v13  ;;  %772 = vmatpush.xpose.msk.msra.mxu3 %vm397_vm0, %v294_v13 }
  0x2b   : > { %374 = vperm.xlu2 %827, %v312_v30  }
  0x2c   : > { %723 = vmatpush.xpose.msk.msra.mxu0 %vm397_vm0, %v293_v16  ;;  %773 = vmatpush.xpose.msk.msra.mxu1 %vm397_vm0, %v293_v16 }
  0x2d   : > { %774 = vmatpush.xpose.msk.msra.mxu2 %vm397_vm0, %v293_v16  ;;  %775 = vmatpush.xpose.msk.msra.mxu3 %vm397_vm0, %v293_v16 }
  0x2e   : > { %379 = vperm.xlu0 %825, %v313_v15  }
  0x2f   : > { %384 = vperm.xlu1 %826, %v314_v24  }
  0x30   : > { %724 = vmatpush.xpose.msk.msra.mxu0 %vm397_vm0, %v292_v17  ;;  %776 = vmatpush.xpose.msk.msra.mxu1 %vm397_vm0, %v292_v17 }
  0x31   : > { %777 = vmatpush.xpose.msk.msra.mxu2 %vm397_vm0, %v292_v17  ;;  %778 = vmatpush.xpose.msk.msra.mxu3 %vm397_vm0, %v292_v17 }
  0x33   : > { %389 = vperm.xlu2 %827, %v315_v36  }
  0x34   : > { %725 = vmatpush.xpose.msk.msra.mxu0 %vm397_vm0, %v291_v21  ;;  %779 = vmatpush.xpose.msk.msra.mxu1 %vm397_vm0, %v291_v21 }
  0x35   : > { %780 = vmatpush.xpose.msk.msra.mxu2 %vm397_vm0, %v291_v21  ;;  %781 = vmatpush.xpose.msk.msra.mxu3 %vm397_vm0, %v291_v21 }
  0x36   : > { %394 = vperm.xlu0 %825, %v316_v20  }
  0x38   : > { %726 = vmatpush.xpose.msk.msra.mxu0 %vm397_vm0, %v290_v22  ;;  %782 = vmatpush.xpose.msk.msra.mxu1 %vm397_vm0, %v290_v22 }
  0x39   : > { %783 = vmatpush.xpose.msk.msra.mxu2 %vm397_vm0, %v290_v22  ;;  %784 = vmatpush.xpose.msk.msra.mxu3 %vm397_vm0, %v290_v22 }
  0x3c   : > { %727 = vmatpush.xpose.msk.msra.mxu0 %vm397_vm0, %v289_v25  ;;  %785 = vmatpush.xpose.msk.msra.mxu1 %vm397_vm0, %v289_v25 }
  0x3d   : > { %786 = vmatpush.xpose.msk.msra.mxu2 %vm397_vm0, %v289_v25  ;;  %787 = vmatpush.xpose.msk.msra.mxu3 %vm397_vm0, %v289_v25 }
  0x40   : > { %728 = vmatpush.xpose.msk.msra.mxu0 %vm397_vm0, %v288_v26  ;;  %788 = vmatpush.xpose.msk.msra.mxu1 %vm397_vm0, %v288_v26 }
  0x41   : > { %789 = vmatpush.xpose.msk.msra.mxu2 %vm397_vm0, %v288_v26  ;;  %790 = vmatpush.xpose.msk.msra.mxu3 %vm397_vm0, %v288_v26 }
  0x44   : > { %729 = vmatpush.xpose.msk.msra.mxu0 %vm397_vm0, %v287_v28  ;;  %791 = vmatpush.xpose.msk.msra.mxu1 %vm397_vm0, %v287_v28 }
  0x45   : > { %792 = vmatpush.xpose.msk.msra.mxu2 %vm397_vm0, %v287_v28  ;;  %793 = vmatpush.xpose.msk.msra.mxu3 %vm397_vm0, %v287_v28 }
  0x48   : > { %730 = vmatpush.xpose.msk.msra.mxu0 %vm397_vm0, %v286_v29  ;;  %794 = vmatpush.xpose.msk.msra.mxu1 %vm397_vm0, %v286_v29 }
  0x49   : > { %795 = vmatpush.xpose.msk.msra.mxu2 %vm397_vm0, %v286_v29  ;;  %796 = vmatpush.xpose.msk.msra.mxu3 %vm397_vm0, %v286_v29 }
  0x4c   : > { %731 = vmatpush.xpose.msk.msra.mxu0 %vm397_vm0, %v285_v31  ;;  %797 = vmatpush.xpose.msk.msra.mxu1 %vm397_vm0, %v285_v31 }
  0x4d   : > { %798 = vmatpush.xpose.msk.msra.mxu2 %vm397_vm0, %v285_v31  ;;  %799 = vmatpush.xpose.msk.msra.mxu3 %vm397_vm0, %v285_v31 }
  0x4f   : > { %732 = vmatmul.msk.f32.vlgmr.msra.gmra.mxu0 %vm397_vm0, %v269_v32  ;;  %736 = vmatmul.msk.f32.vlgmr.msra.gmra.mxu1 %vm397_vm0, %v273_v33 }
  0x50   : > { %740 = vmatmul.msk.f32.vlgmr.msra.gmra.mxu2 %vm397_vm0, %v277_v34  ;;  %744 = vmatmul.msk.f32.vlgmr.msra.gmra.mxu3 %vm397_vm0, %v281_v35 }
  0x57   : > { %733 = vmatmul.msk.f32.gmra.mxu0 %vm397_vm0, %v270_v37  ;;  %737 = vmatmul.msk.f32.gmra.mxu1 %vm397_vm0, %v274_v38 }
  0x58   : > { %741 = vmatmul.msk.f32.gmra.mxu2 %vm397_vm0, %v278_v39  ;;  %745 = vmatmul.msk.f32.gmra.mxu3 %vm397_vm0, %v282_v40 }
  0x5f   : > { %734 = vmatmul.msk.f32.gmra.mxu0 %vm397_vm0, %v271_v41  ;;  %738 = vmatmul.msk.f32.gmra.mxu1 %vm397_vm0, %v275_v42 }
  0x60   : > { %742 = vmatmul.msk.f32.gmra.mxu2 %vm397_vm0, %v279_v43  ;;  %746 = vmatmul.msk.f32.gmra.mxu3 %vm397_vm0, %v283_v44 }
  0x67   : > { %735 = vmatmul.msk.f32.gmra.mxu0 %vm397_vm0, %v272_v45  ;;  %739 = vmatmul.msk.f32.gmra.mxu1 %vm397_vm0, %v276_v46 }
  0x68   : > { %743 = vmatmul.msk.f32.gmra.mxu2 %vm397_vm0, %v280_v47  ;;  %747 = vmatmul.msk.f32.gmra.mxu3 %vm397_vm0, %v284_v48 }
  0x6d   : > { %v340_v52 = vpop.permute.xlu2 %339 }
  0x75   : > { %v345_v55 = vpop.permute.xlu2 %344 }
  0x7d   : > { %v360_v62 = vpop.permute.xlu2 %359 }
  0x80   : > { %v320_v49 = vpop.permute.xlu0 %319 }
  0x81   : > { %v330_v50 = vpop.permute.xlu1 %329 }
  0x85   : > { %v375_v9 = vpop.permute.xlu2 %374 }
  0x88   : > { %v325_v51 = vpop.permute.xlu0 %324 }
  0x89   : > { %v335_v53 = vpop.permute.xlu1 %334 }
  0x8d   : > { %v390_v19 = vpop.permute.xlu2 %389 }
  0x90   : > { %v350_v54 = vpop.permute.xlu0 %349 }
  0x91   : > { %v355_v56 = vpop.permute.xlu1 %354 }
  0x98   : > { %v365_v57 = vpop.permute.xlu0 %364 }
  0x99   : > { %v370_v63 = vpop.permute.xlu1 %369 }
  0xa0   : > { %v380_v0 = vpop.permute.xlu0 %379 }
  0xa1   : > { %v385_v10 = vpop.permute.xlu1 %384 }
  0xa8   : > { %v395_v28 = vpop.permute.xlu0 %394 }
  0xcc   : > { %v511_v58 = vpop.f32.mrf.mxu0  ;;  %v523_v59 = vpop.f32.mrf.mxu1 }
  0xcd   : > { %v512_v60 = vadd.f32 %v511_v58, %v320_v49  ;;  %v524_v61 = vadd.f32 %v523_v59, %v340_v52 }
  0xcf   : > { %559 = vst [vmem:[%s1098_s20] sm:$0xff] %v512_v60 }
  0xd0   : > { %563 = vst [vmem:[%s1098_s20 + $0x20] sm:$0xff] %v524_v61 }
  0xd3   : > { %v535_v1 = vpop.f32.mrf.mxu2  ;;  %v547_v2 = vpop.f32.mrf.mxu3 }
  0xd4   : > { %v536_v3 = vadd.f32 %v535_v1, %v360_v62  ;;  %v548_v4 = vadd.f32 %v547_v2, %v380_v0  ;;  %v514_v5 = vpop.f32.mrf.mxu0  ;;  %v526_v6 = vpop.f32.mrf.mxu1 }
  0xd5   : > { %v515_v7 = vadd.f32 %v514_v5, %v325_v51  ;;  %v527_v8 = vadd.f32 %v526_v6, %v345_v55 }
  0xd6   : > { %567 = vst [vmem:[%s1098_s20 + $0x40] sm:$0xff] %v536_v3 }
  0xd7   : > { %571 = vst [vmem:[%s1098_s20 + $0x60] sm:$0xff] %v548_v4 }
  0xd8   : > { %560 = vst [vmem:[%s1098_s20 + $0x8] sm:$0xff] %v515_v7 }
  0xd9   : > { %564 = vst [vmem:[%s1098_s20 + $0x28] sm:$0xff] %v527_v8 }
  0xdb   : > { %v538_v11 = vpop.f32.mrf.mxu2  ;;  %v550_v12 = vpop.f32.mrf.mxu3 }
  0xdc   : > { %v539_v13 = vadd.f32 %v538_v11, %v365_v57  ;;  %v551_v14 = vadd.f32 %v550_v12, %v385_v10  ;;  %v517_v15 = vpop.f32.mrf.mxu0  ;;  %v529_v16 = vpop.f32.mrf.mxu1 }
  0xdd   : > { %v518_v17 = vadd.f32 %v517_v15, %v330_v50  ;;  %v530_v18 = vadd.f32 %v529_v16, %v350_v54 }
  0xde   : > { %568 = vst [vmem:[%s1098_s20 + $0x48] sm:$0xff] %v539_v13 }
  0xdf   : > { %572 = vst [vmem:[%s1098_s20 + $0x68] sm:$0xff] %v551_v14 }
  0xe0   : > { %561 = vst [vmem:[%s1098_s20 + $0x10] sm:$0xff] %v518_v17 }
  0xe1   : > { %565 = vst [vmem:[%s1098_s20 + $0x30] sm:$0xff] %v530_v18 }
  0xe3   : > { %v541_v20 = vpop.f32.mrf.mxu2  ;;  %v553_v21 = vpop.f32.mrf.mxu3 }
  0xe4   : > { %v542_v22 = vadd.f32 %v541_v20, %v370_v63  ;;  %v554_v23 = vadd.f32 %v553_v21, %v390_v19  ;;  %v520_v24 = vpop.f32.mrf.mxu0  ;;  %v532_v25 = vpop.f32.mrf.mxu1 }
  0xe5   : > { %v521_v26 = vadd.f32 %v520_v24, %v335_v53  ;;  %v533_v27 = vadd.f32 %v532_v25, %v355_v56 }
  0xe6   : > { %569 = vst [vmem:[%s1098_s20 + $0x50] sm:$0xff] %v542_v22 }
  0xe7   : > { %573 = vst [vmem:[%s1098_s20 + $0x70] sm:$0xff] %v554_v23 }
  0xe8   : > { %562 = vst [vmem:[%s1098_s20 + $0x18] sm:$0xff] %v521_v26 }
  0xe9   : > { %566 = vst [vmem:[%s1098_s20 + $0x38] sm:$0xff] %v533_v27 }
  0xeb   : > { %v544_v29 = vpop.f32.mrf.mxu2  ;;  %v556_v30 = vpop.f32.mrf.mxu3 }
  0xec   : > { %v545_v31 = vadd.f32 %v544_v29, %v375_v9  ;;  %v557_v32 = vadd.f32 %v556_v30, %v395_v28 }
  0xee   : > { %570 = vst [vmem:[%s1098_s20 + $0x58] sm:$0xff] %v545_v31 }
  0xef   : > { %574 = vst [vmem:[%s1098_s20 + $0x78] sm:$0xff] %v557_v32 }
  0xf0 PF: > { %s13_s14 = sadd.s32 1, %s850_s14   ;;  %s1129_s12 = smov %s846_s13 }
  0xf1   : > { %p10_p5 = scmp.ge.s32.totalorder %s13_s14, 4   ;;  %s1130_s13 = smov %s1132_s15 }
  0xf3   :  { %12 = sbr.rel (!%p10_p5) target bundleno = 2 (0x2), region = 68 }

// kernel: lstm_lm_forward.3
= control target key start
LH: loop header
LB: loop body
LE: loop exit
PB: predicated region body
PF: predicated region fallthrough
CT: control target
= control target key end

     0   :  { %vm22_vm0 = vcmask 130048   ;;  %s108_s1 = inlined_call_operand.vmem [shape: f32[16,128], index: 1, kind: input, shape index: {}]   ;;  %s109_s0 = inlined_call_operand.vmem [shape: f32[16,16], index: 0, kind: input, shape index: {}]   ;;  %s110_s2 = inlined_call_operand.vmem [shape: f32[1,128], index: 2, kind: input, shape index: {}]   ;;  %s111_s3 = inlined_call_operand.vmem [shape: bf16[16,128], index: 3, kind: output, shape index: {}]  }
   0x1   :  { %v17_v0 = vld [vmem:[%s108_s1 + $0x8] sm:$0xff]  ;;  %v16_v1 = vld [vmem:[%s108_s1] sm:$0xff] }
   0x2   :  { %43 = vmatpush.msra.mxu0 %v17_v0  ;;  %67 = vmatpush.msra.mxu1 %v17_v0  ;;  %v14_v2 = vld [vmem:[%s109_s0] sm:$0xff]  ;;  %v15_v3 = vld [vmem:[%s109_s0 + $0x8] sm:$0xff] }
   0x3   :  { %v69_v4 = vld [vmem:[%s110_s2] ss:$0 sm:$0xff] }
   0x4   :  { %44 = vmatpush.msra.mxu0 %v16_v1  ;;  %68 = vmatpush.msra.mxu1 %v16_v1 }
   0x5   :  { %60 = vmatmul.msk.f32.vlgmr.msra.gmra.mxu0 %vm22_vm0, %v14_v2  ;;  %61 = vmatmul.msk.f32.vlgmr.msra.gmra.mxu1 %vm22_vm0, %v15_v3 }
  0x82   :  { %v46_v5 = vpop.f32.mrf.mxu0  ;;  %v49_v6 = vpop.f32.mrf.mxu1 }
  0x83   :  { %v47_v7 = vadd.f32 %v69_v4, %v46_v5  ;;  %v50_v8 = vadd.f32 %v69_v4, %v49_v6 }
  0x85   :  { %v65_v9 = vpack.c.bf16 %v50_v8, %v47_v7 }
  0x87   :  { %66 = vst [vmem:[%s111_s3] sm:$0xff] %v65_v9  }

// kernel: lstm_lm_forward.4
= control target key start
LH: loop header
LB: loop body
LE: loop exit
PB: predicated region body
PF: predicated region fallthrough
CT: control target
= control target key end

     0   :  { %vm16_vm0 = vcmask 254976   ;;  %v715_v1 = vmov 0.0   ;;  %vm40_vm1 = vcmask 261120   ;;  %s716_s14 = smov 64   ;;  %s717_s15 = smov 32   ;;  %s864_s1 = inlined_call_operand.vmem [shape: bf16[32,128], index: 1, kind: input, shape index: {}]   ;;  %s865_s0 = inlined_call_operand.vmem [shape: bf16[8,2,128], index: 0, kind: input, shape index: {}]   ;;  %s866_s2 = inlined_call_operand.vmem [shape: f32[8,2,32], index: 2, kind: output, shape index: {}]  }
   0x1   :  { %v646_v0 = vld [vmem:[%s864_s1 + $0x8] sm:$0xff]  ;;  %17 = vst.msk [vmem:[#allocation2] sm:$0x3] %vm16_vm0, %v715_v1  ;;  %v645_v2 = vld [vmem:[%s864_s1] sm:$0xff] }
   0x2   :  { %18 = vst.msk [vmem:[#allocation3] sm:$0x3] %vm16_vm0, %v715_v1  ;;  %50 = vmatpush.bf16.msra.mxu0 %v646_v0  ;;  %123 = vmatpush.bf16.msra.mxu1 %v646_v0  ;;  %v25_v5 = vld [vmem:[%s865_s0] sm:$0x1]  ;;  %v617_v36 = vld [vmem:[%s865_s0 + $0x1] sm:$0x1] }
   0x3   :  { %192 = vmatpush.bf16.msra.mxu2 %v646_v0  ;;  %261 = vmatpush.bf16.msra.mxu3 %v646_v0  ;;  %v26_v6 = vunpack.c.l.bf16 %v25_v5  ;;  %v109_v37 = vunpack.c.l.bf16 %v617_v36 }
   0x6   :  { %51 = vmatpush.bf16.msra.mxu0 %v645_v2  ;;  %124 = vmatpush.bf16.msra.mxu1 %v645_v2 }
   0x7   :  { %193 = vmatpush.bf16.msra.mxu2 %v645_v2  ;;  %262 = vmatpush.bf16.msra.mxu3 %v645_v2 }
   0x8   :  { %v23_v3 = vld [vmem:[#allocation2] sm:$0x3] }
   0x9   :  { %v27_v4 = vpack.c.bf16 %v23_v3, %v23_v3  ;;  %v24_v11 = vld [vmem:[#allocation3] sm:$0x3] }
   0xa   :  { %330 = vmatpush.bf16.msrb.mxu0 %v646_v0  ;;  %399 = vmatpush.bf16.msrb.mxu1 %v646_v0 }
   0xb   :  { %468 = vmatpush.bf16.msrb.mxu2 %v646_v0  ;;  %537 = vmatpush.bf16.msrb.mxu3 %v646_v0 }
   0xc   :  { %615 = vmatmul.msk.bf16.vlgmr.msra.gmra.mxu0 %vm40_vm1, %v27_v4 }
   0xe   :  { %331 = vmatpush.bf16.msrb.mxu0 %v645_v2  ;;  %400 = vmatpush.bf16.msrb.mxu1 %v645_v2 }
   0xf   :  { %469 = vmatpush.bf16.msrb.mxu2 %v645_v2  ;;  %538 = vmatpush.bf16.msrb.mxu3 %v645_v2  ;;  %v621_v2 = vld [vmem:[%s865_s0 + $0x2] sm:$0x1] }
  0x10   :  { %v178_v3 = vunpack.c.l.bf16 %v621_v2 }
  0x89   :  { %v53_v7 = vpop.f32.mrf.mxu0 }
  0x8a   :  { %v57_v8 = vadd.f32 %v53_v7, %v26_v6 }
  0x8c   :  { %651 = vtanh.f32 %v57_v8  ;;  %v616_v12 = vmul.f32 -1.442695, %v57_v8 }
  0x8e   :  { %653 = vpow2.f32 %v616_v12 }
  0x91   :  { %v55_v9 = vpop.f32.mrf.mxu0 }
  0x92   :  { %v652_v10 = vpop.eup %651 }
  0x93   :  { %84 = vrot.lane.b32.xlu0 %v652_v10, %s716_s14 }
  0x94   :  { %v654_v13 = vpop.eup %653 }
  0x95   :  { %v61_v14 = vadd.f32 1.0, %v654_v13 }
  0x97   :  { %655 = vrcp.f32 %v61_v14  ;;  %v73_v20 = vand.u32 2147483648, %v61_v14  ;;  %vm67_vm3 = vweird.f32 %v61_v14  ;;  %v71_v21 = vand.u32 2147483647, %v61_v14 }
  0x99   :  { %v74_v23 = vor.u32 1.1754944e-38, %v73_v20  ;;  %vm72_vm5 = vcmp.eq.f32.partialorder %v71_v21, 8.507059e+37 }
  0x9b   :  { %79 = vrot.lane.b32.xlu0 %v24_v11, %s717_s15 }
  0x9d   :  { %v656_v15 = vpop.eup %655 }
  0x9e   :  { %v63_v16 = vmul.f32 %v656_v15, %v61_v14  ;;  %vm68_vm2 = vweird.f32 %v656_v15 }
  0x9f   :  { %vm69_vm4 = vmor %vm67_vm3, %vm68_vm2 }
  0xa0   :  { %v64_v17 = vsub.f32 1.0, %v63_v16 }
  0xa2   :  { %v65_v18 = vmul.f32 %v656_v15, %v64_v17 }
  0xa4   :  { %v66_v19 = vadd.f32 %v656_v15, %v65_v18 }
  0xa6   :  { %v70_v22 = vsel %vm69_vm4, %v656_v15, %v66_v19 }
  0xa7   :  { %v75_v25 = vsel %vm72_vm5, %v74_v23, %v70_v22 }
 0x105   :  { %v85_v24 = vpop.permute.xlu0 %84 }
 0x106   :  { %v87_v26 = vmul.f32 %v85_v24, %v75_v25 }
 0x108   :  { %89 = vrot.lane.b32.xlu1 %v87_v26, %s717_s15 }
 0x10d   :  { %v80_v27 = vpop.permute.xlu0 %79 }
 0x10e   :  { %v82_v28 = vmul.f32 %v80_v27, %v75_v25 }
 0x17a   :  { %v90_v29 = vpop.permute.xlu1 %89 }
 0x17b   :  { %v92_v30 = vadd.f32 %v90_v29, %v82_v28 }
 0x17d   :  { %657 = vtanh.f32 %v92_v30 }
 0x183   :  { %v658_v31 = vpop.eup %657 }
 0x184   :  { %95 = vrot.lane.b32.xlu1 %v658_v31, %s716_s14 }
 0x1f6   :  { %v96_v32 = vpop.permute.xlu1 %95 }
 0x1f7   :  { %v98_v33 = vmul.f32 %v96_v32, %v75_v25  ;;  %v625_v32 = vld [vmem:[%s865_s0 + $0x3] sm:$0x1] }
 0x1f9   :  { %100 = vst [vmem:[#allocation1] ss:$4 sm:$0xff] %v98_v33  ;;  %v110_v34 = vpack.c.bf16 %v98_v33, %v98_v33  ;;  %v247_v33 = vunpack.c.l.bf16 %v625_v32 }
 0x1fb   :  { %112 = vrot.lane.b32.xlu2 %v110_v34, %s717_s15 }
 0x200   :  { %v758_v63 = vld.sshfl [vmem:[#allocation1] sm:$0xff pattern:$0x73625140] }
 0x255   :  { %v113_v35 = vpop.permute.xlu2 %112 }
 0x256   :  { %618 = vmatmul.msk.bf16.vlgmr.msra.gmra.mxu1 %vm40_vm1, %v113_v35 }
 0x2d3   :  { %v126_v38 = vpop.f32.mrf.mxu1 }
 0x2d4   :  { %v130_v39 = vadd.f32 %v126_v38, %v109_v37 }
 0x2d6   :  { %659 = vtanh.f32 %v130_v39  ;;  %v619_v42 = vmul.f32 -1.442695, %v130_v39 }
 0x2d8   :  { %661 = vpow2.f32 %v619_v42 }
 0x2db   :  { %v128_v40 = vpop.f32.mrf.mxu1 }
 0x2dc   :  { %v660_v41 = vpop.eup %659 }
 0x2dd   :  { %153 = vrot.lane.b32.xlu2 %v660_v41, %s716_s14 }
 0x2de   :  { %v662_v43 = vpop.eup %661 }
 0x2df   :  { %v134_v44 = vadd.f32 1.0, %v662_v43 }
 0x2e1   :  { %663 = vrcp.f32 %v134_v44  ;;  %v146_v50 = vand.u32 2147483648, %v134_v44  ;;  %vm140_vm7 = vweird.f32 %v134_v44  ;;  %v144_v51 = vand.u32 2147483647, %v134_v44 }
 0x2e3   :  { %v147_v53 = vor.u32 1.1754944e-38, %v146_v50  ;;  %vm145_vm9 = vcmp.eq.f32.partialorder %v144_v51, 8.507059e+37 }
 0x2e7   :  { %v664_v45 = vpop.eup %663 }
 0x2e8   :  { %v136_v46 = vmul.f32 %v664_v45, %v134_v44  ;;  %vm141_vm6 = vweird.f32 %v664_v45 }
 0x2e9   :  { %vm142_vm8 = vmor %vm140_vm7, %vm141_vm6 }
 0x2ea   :  { %v137_v47 = vsub.f32 1.0, %v136_v46 }
 0x2ec   :  { %v138_v48 = vmul.f32 %v664_v45, %v137_v47 }
 0x2ee   :  { %v139_v49 = vadd.f32 %v664_v45, %v138_v48 }
 0x2f0   :  { %v143_v52 = vsel %vm142_vm8, %v664_v45, %v139_v49 }
 0x2f1   :  { %v148_v55 = vsel %vm145_vm9, %v147_v53, %v143_v52 }
 0x2f2   :  { %v151_v57 = vmul.f32 %v148_v55, %v92_v30 }
 0x337   :  { %v154_v54 = vpop.permute.xlu2 %153 }
 0x338   :  { %v156_v56 = vmul.f32 %v154_v54, %v148_v55 }
 0x33a   :  { %158 = vrot.lane.b32.xlu0 %v156_v56, %s717_s15 }
 0x3ac   :  { %v159_v58 = vpop.permute.xlu0 %158 }
 0x3ad   :  { %v161_v59 = vadd.f32 %v159_v58, %v151_v57 }
 0x3af   :  { %665 = vtanh.f32 %v161_v59 }
 0x3b5   :  { %v666_v60 = vpop.eup %665 }
 0x3b6   :  { %164 = vrot.lane.b32.xlu1 %v666_v60, %s716_s14 }
 0x428   :  { %v165_v61 = vpop.permute.xlu1 %164 }
 0x429   :  { %v167_v62 = vmul.f32 %v165_v61, %v148_v55 }
 0x42b   :  { %169 = vst [vmem:[#allocation1] ss:$4 sm:$0xff] %v167_v62  ;;  %v179_v0 = vpack.c.bf16 %v167_v62, %v167_v62  ;;  %v629_v62 = vld [vmem:[%s865_s0 + $0x4] sm:$0x1] }
 0x42d   :  { %181 = vrot.lane.b32.xlu2 %v179_v0, %s717_s15  ;;  %v316_v0 = vunpack.c.l.bf16 %v629_v62 }
 0x432   :  { %v768_v29 = vld.sshfl [vmem:[#allocation1] sm:$0xff pattern:$0x73625140] }
 0x487   :  { %v182_v1 = vpop.permute.xlu2 %181 }
 0x488   :  { %622 = vmatmul.msk.bf16.vlgmr.msra.gmra.mxu2 %vm40_vm1, %v182_v1 }
 0x50b   :  { %v195_v4 = vpop.f32.mrf.mxu2 }
 0x50c   :  { %v199_v5 = vadd.f32 %v195_v4, %v178_v3 }
 0x50e   :  { %667 = vtanh.f32 %v199_v5  ;;  %v623_v8 = vmul.f32 -1.442695, %v199_v5 }
 0x510   :  { %669 = vpow2.f32 %v623_v8 }
 0x513   :  { %v197_v6 = vpop.f32.mrf.mxu2 }
 0x514   :  { %v668_v7 = vpop.eup %667 }
 0x515   :  { %222 = vrot.lane.b32.xlu0 %v668_v7, %s716_s14 }
 0x516   :  { %v670_v9 = vpop.eup %669 }
 0x517   :  { %v203_v10 = vadd.f32 1.0, %v670_v9 }
 0x519   :  { %671 = vrcp.f32 %v203_v10  ;;  %v215_v16 = vand.u32 2147483648, %v203_v10  ;;  %vm209_vm11 = vweird.f32 %v203_v10  ;;  %v213_v17 = vand.u32 2147483647, %v203_v10 }
 0x51b   :  { %v216_v19 = vor.u32 1.1754944e-38, %v215_v16  ;;  %vm214_vm13 = vcmp.eq.f32.partialorder %v213_v17, 8.507059e+37 }
 0x51f   :  { %v672_v11 = vpop.eup %671 }
 0x520   :  { %v205_v12 = vmul.f32 %v672_v11, %v203_v10  ;;  %vm210_vm10 = vweird.f32 %v672_v11 }
 0x521   :  { %vm211_vm12 = vmor %vm209_vm11, %vm210_vm10 }
 0x522   :  { %v206_v13 = vsub.f32 1.0, %v205_v12 }
 0x524   :  { %v207_v14 = vmul.f32 %v672_v11, %v206_v13 }
 0x526   :  { %v208_v15 = vadd.f32 %v672_v11, %v207_v14 }
 0x528   :  { %v212_v18 = vsel %vm211_vm12, %v672_v11, %v208_v15 }
 0x529   :  { %v217_v21 = vsel %vm214_vm13, %v216_v19, %v212_v18 }
 0x52a   :  { %v220_v23 = vmul.f32 %v217_v21, %v161_v59 }
 0x587   :  { %v223_v20 = vpop.permute.xlu0 %222 }
 0x588   :  { %v225_v22 = vmul.f32 %v223_v20, %v217_v21 }
 0x58a   :  { %227 = vrot.lane.b32.xlu1 %v225_v22, %s717_s15 }
 0x5fc   :  { %v228_v24 = vpop.permute.xlu1 %227 }
 0x5fd   :  { %v230_v25 = vadd.f32 %v228_v24, %v220_v23 }
 0x5ff   :  { %673 = vtanh.f32 %v230_v25 }
 0x605   :  { %v674_v26 = vpop.eup %673 }
 0x606   :  { %233 = vrot.lane.b32.xlu2 %v674_v26, %s716_s14 }
 0x660   :  { %v234_v27 = vpop.permute.xlu2 %233 }
 0x661   :  { %v236_v28 = vmul.f32 %v234_v27, %v217_v21 }
 0x663   :  { %238 = vst [vmem:[#allocation1] ss:$4 sm:$0xff] %v236_v28  ;;  %v248_v30 = vpack.c.bf16 %v236_v28, %v236_v28 }
 0x665   :  { %250 = vrot.lane.b32.xlu0 %v248_v30, %s717_s15  ;;  %v633_v30 = vld [vmem:[%s865_s0 + $0x5] sm:$0x1] }
 0x66a   :  { %v778_v59 = vld.sshfl [vmem:[#allocation1] sm:$0xff pattern:$0x73625140] }
 0x6d7   :  { %v251_v31 = vpop.permute.xlu0 %250 }
 0x6d8   :  { %626 = vmatmul.msk.bf16.vlgmr.msra.gmra.mxu3 %vm40_vm1, %v251_v31  ;;  %v385_v31 = vunpack.c.l.bf16 %v633_v30  ;;  %v641_v30 = vld [vmem:[%s865_s0 + $0x7] sm:$0x1] }
 0x75b   :  { %v264_v34 = vpop.f32.mrf.mxu3 }
 0x75c   :  { %v268_v35 = vadd.f32 %v264_v34, %v247_v33 }
 0x75e   :  { %675 = vtanh.f32 %v268_v35  ;;  %v627_v38 = vmul.f32 -1.442695, %v268_v35 }
 0x760   :  { %677 = vpow2.f32 %v627_v38 }
 0x763   :  { %v266_v36 = vpop.f32.mrf.mxu3 }
 0x764   :  { %v676_v37 = vpop.eup %675 }
 0x765   :  { %291 = vrot.lane.b32.xlu1 %v676_v37, %s716_s14 }
 0x766   :  { %v678_v39 = vpop.eup %677 }
 0x767   :  { %v272_v40 = vadd.f32 1.0, %v678_v39 }
 0x769   :  { %679 = vrcp.f32 %v272_v40  ;;  %v284_v46 = vand.u32 2147483648, %v272_v40  ;;  %vm278_vm15 = vweird.f32 %v272_v40  ;;  %v282_v47 = vand.u32 2147483647, %v272_v40 }
 0x76b   :  { %v285_v49 = vor.u32 1.1754944e-38, %v284_v46  ;;  %vm283_vm3 = vcmp.eq.f32.partialorder %v282_v47, 8.507059e+37 }
 0x76f   :  { %v680_v41 = vpop.eup %679 }
 0x770   :  { %v274_v42 = vmul.f32 %v680_v41, %v272_v40  ;;  %vm279_vm14 = vweird.f32 %v680_v41 }
 0x771   :  { %vm280_vm2 = vmor %vm278_vm15, %vm279_vm14 }
 0x772   :  { %v275_v43 = vsub.f32 1.0, %v274_v42 }
 0x774   :  { %v276_v44 = vmul.f32 %v680_v41, %v275_v43 }
 0x776   :  { %v277_v45 = vadd.f32 %v680_v41, %v276_v44 }
 0x778   :  { %v281_v48 = vsel %vm280_vm2, %v680_v41, %v277_v45 }
 0x779   :  { %v286_v51 = vsel %vm283_vm3, %v285_v49, %v281_v48 }
 0x77a   :  { %v289_v53 = vmul.f32 %v286_v51, %v230_v25 }
 0x7d7   :  { %v292_v50 = vpop.permute.xlu1 %291 }
 0x7d8   :  { %v294_v52 = vmul.f32 %v292_v50, %v286_v51 }
 0x7da   :  { %296 = vrot.lane.b32.xlu2 %v294_v52, %s717_s15 }
 0x834   :  { %v297_v54 = vpop.permute.xlu2 %296 }
 0x835   :  { %v299_v55 = vadd.f32 %v297_v54, %v289_v53 }
 0x837   :  { %681 = vtanh.f32 %v299_v55 }
 0x83d   :  { %v682_v56 = vpop.eup %681 }
 0x83e   :  { %302 = vrot.lane.b32.xlu0 %v682_v56, %s716_s14 }
 0x8b0   :  { %v303_v57 = vpop.permute.xlu0 %302 }
 0x8b1   :  { %v305_v58 = vmul.f32 %v303_v57, %v286_v51 }
 0x8b3   :  { %307 = vst [vmem:[#allocation1] ss:$4 sm:$0xff] %v305_v58  ;;  %v317_v60 = vpack.c.bf16 %v305_v58, %v305_v58 }
 0x8b5   :  { %319 = vrot.lane.b32.xlu1 %v317_v60, %s717_s15 }
 0x8ba   :  { %v788_v26 = vld.sshfl [vmem:[#allocation1] sm:$0xff pattern:$0x73625140] }
 0x927   :  { %v320_v61 = vpop.permute.xlu1 %319 }
 0x928   :  { %630 = vmatmul.msk.bf16.vlgmr.msrb.gmra.mxu0 %vm40_vm1, %v320_v61  ;;  %v637_v61 = vld [vmem:[%s865_s0 + $0x6] sm:$0x1] }
 0x929   :  { %v454_v62 = vunpack.c.l.bf16 %v637_v61 }
 0x9a5   :  { %v333_v1 = vpop.f32.mrf.mxu0 }
 0x9a6   :  { %v337_v2 = vadd.f32 %v333_v1, %v316_v0 }
 0x9a8   :  { %683 = vtanh.f32 %v337_v2  ;;  %v631_v5 = vmul.f32 -1.442695, %v337_v2 }
 0x9aa   :  { %685 = vpow2.f32 %v631_v5 }
 0x9ad   :  { %v335_v3 = vpop.f32.mrf.mxu0 }
 0x9ae   :  { %v684_v4 = vpop.eup %683 }
 0x9af   :  { %360 = vrot.lane.b32.xlu2 %v684_v4, %s716_s14 }
 0x9b0   :  { %v686_v6 = vpop.eup %685 }
 0x9b1   :  { %v341_v7 = vadd.f32 1.0, %v686_v6 }
 0x9b3   :  { %687 = vrcp.f32 %v341_v7  ;;  %v353_v13 = vand.u32 2147483648, %v341_v7  ;;  %vm347_vm5 = vweird.f32 %v341_v7  ;;  %v351_v14 = vand.u32 2147483647, %v341_v7 }
 0x9b5   :  { %v354_v16 = vor.u32 1.1754944e-38, %v353_v13  ;;  %vm352_vm7 = vcmp.eq.f32.partialorder %v351_v14, 8.507059e+37 }
 0x9b9   :  { %v688_v8 = vpop.eup %687 }
 0x9ba   :  { %v343_v9 = vmul.f32 %v688_v8, %v341_v7  ;;  %vm348_vm4 = vweird.f32 %v688_v8 }
 0x9bb   :  { %vm349_vm6 = vmor %vm347_vm5, %vm348_vm4 }
 0x9bc   :  { %v344_v10 = vsub.f32 1.0, %v343_v9 }
 0x9be   :  { %v345_v11 = vmul.f32 %v688_v8, %v344_v10 }
 0x9c0   :  { %v346_v12 = vadd.f32 %v688_v8, %v345_v11 }
 0x9c2   :  { %v350_v15 = vsel %vm349_vm6, %v688_v8, %v346_v12 }
 0x9c3   :  { %v355_v18 = vsel %vm352_vm7, %v354_v16, %v350_v15 }
 0x9c4   :  { %v358_v20 = vmul.f32 %v355_v18, %v299_v55 }
 0xa09   :  { %v361_v17 = vpop.permute.xlu2 %360 }
 0xa0a   :  { %v363_v19 = vmul.f32 %v361_v17, %v355_v18 }
 0xa0c   :  { %365 = vrot.lane.b32.xlu0 %v363_v19, %s717_s15 }
 0xa7e   :  { %v366_v21 = vpop.permute.xlu0 %365 }
 0xa7f   :  { %v368_v22 = vadd.f32 %v366_v21, %v358_v20 }
 0xa81   :  { %689 = vtanh.f32 %v368_v22 }
 0xa87   :  { %v690_v23 = vpop.eup %689 }
 0xa88   :  { %371 = vrot.lane.b32.xlu1 %v690_v23, %s716_s14 }
 0xafa   :  { %v372_v24 = vpop.permute.xlu1 %371 }
 0xafb   :  { %v374_v25 = vmul.f32 %v372_v24, %v355_v18 }
 0xafd   :  { %v386_v27 = vpack.c.bf16 %v374_v25, %v374_v25  ;;  %376 = vst [vmem:[#allocation1] ss:$4 sm:$0xff] %v374_v25 }
 0xaff   :  { %388 = vrot.lane.b32.xlu2 %v386_v27, %s717_s15 }
 0xb04   :  { %v798_v57 = vld.sshfl [vmem:[#allocation1] sm:$0xff pattern:$0x73625140] }
 0xb59   :  { %v389_v28 = vpop.permute.xlu2 %388 }
 0xb5a   :  { %634 = vmatmul.msk.bf16.vlgmr.msrb.gmra.mxu1 %vm40_vm1, %v389_v28 }
 0xbd7   :  { %v402_v32 = vpop.f32.mrf.mxu1 }
 0xbd8   :  { %v406_v33 = vadd.f32 %v402_v32, %v385_v31  ;;  %v523_v31 = vunpack.c.l.bf16 %v641_v30 }
 0xbda   :  { %691 = vtanh.f32 %v406_v33  ;;  %v635_v36 = vmul.f32 -1.442695, %v406_v33 }
 0xbdc   :  { %693 = vpow2.f32 %v635_v36 }
 0xbdf   :  { %v404_v34 = vpop.f32.mrf.mxu1 }
 0xbe0   :  { %v692_v35 = vpop.eup %691 }
 0xbe1   :  { %429 = vrot.lane.b32.xlu0 %v692_v35, %s716_s14 }
 0xbe2   :  { %v694_v37 = vpop.eup %693 }
 0xbe3   :  { %v410_v38 = vadd.f32 1.0, %v694_v37 }
 0xbe5   :  { %695 = vrcp.f32 %v410_v38  ;;  %v422_v44 = vand.u32 2147483648, %v410_v38  ;;  %vm416_vm9 = vweird.f32 %v410_v38  ;;  %v420_v45 = vand.u32 2147483647, %v410_v38 }
 0xbe7   :  { %v423_v47 = vor.u32 1.1754944e-38, %v422_v44  ;;  %vm421_vm11 = vcmp.eq.f32.partialorder %v420_v45, 8.507059e+37 }
 0xbeb   :  { %v696_v39 = vpop.eup %695 }
 0xbec   :  { %v412_v40 = vmul.f32 %v696_v39, %v410_v38  ;;  %vm417_vm8 = vweird.f32 %v696_v39 }
 0xbed   :  { %vm418_vm10 = vmor %vm416_vm9, %vm417_vm8 }
 0xbee   :  { %v413_v41 = vsub.f32 1.0, %v412_v40 }
 0xbf0   :  { %v414_v42 = vmul.f32 %v696_v39, %v413_v41 }
 0xbf2   :  { %v415_v43 = vadd.f32 %v696_v39, %v414_v42 }
 0xbf4   :  { %v419_v46 = vsel %vm418_vm10, %v696_v39, %v415_v43 }
 0xbf5   :  { %v424_v49 = vsel %vm421_vm11, %v423_v47, %v419_v46 }
 0xbf6   :  { %v427_v51 = vmul.f32 %v424_v49, %v368_v22 }
 0xc53   :  { %v430_v48 = vpop.permute.xlu0 %429 }
 0xc54   :  { %v432_v50 = vmul.f32 %v430_v48, %v424_v49 }
 0xc56   :  { %434 = vrot.lane.b32.xlu1 %v432_v50, %s717_s15 }
 0xcc8   :  { %v435_v52 = vpop.permute.xlu1 %434 }
 0xcc9   :  { %v437_v53 = vadd.f32 %v435_v52, %v427_v51 }
 0xccb   :  { %697 = vtanh.f32 %v437_v53 }
 0xcd1   :  { %v698_v54 = vpop.eup %697 }
 0xcd2   :  { %440 = vrot.lane.b32.xlu2 %v698_v54, %s716_s14 }
 0xd2c   :  { %v441_v55 = vpop.permute.xlu2 %440 }
 0xd2d   :  { %v443_v56 = vmul.f32 %v441_v55, %v424_v49 }
 0xd2f   :  { %v455_v58 = vpack.c.bf16 %v443_v56, %v443_v56  ;;  %445 = vst [vmem:[#allocation1] ss:$4 sm:$0xff] %v443_v56 }
 0xd31   :  { %457 = vrot.lane.b32.xlu0 %v455_v58, %s717_s15 }
 0xd36   :  { %v446_v25 = vld.sshfl [vmem:[#allocation1] sm:$0xff pattern:$0x73625140] }
 0xda3   :  { %v458_v60 = vpop.permute.xlu0 %457 }
 0xda4   :  { %638 = vmatmul.msk.bf16.vlgmr.msrb.gmra.mxu2 %vm40_vm1, %v458_v60 }
 0xe27   :  { %v471_v0 = vpop.f32.mrf.mxu2 }
 0xe28   :  { %v475_v1 = vadd.f32 %v471_v0, %v454_v62 }
 0xe2a   :  { %699 = vtanh.f32 %v475_v1  ;;  %v639_v4 = vmul.f32 -1.442695, %v475_v1 }
 0xe2c   :  { %701 = vpow2.f32 %v639_v4 }
 0xe2f   :  { %v473_v2 = vpop.f32.mrf.mxu2 }
 0xe30   :  { %v700_v3 = vpop.eup %699 }
 0xe31   :  { %498 = vrot.lane.b32.xlu1 %v700_v3, %s716_s14 }
 0xe32   :  { %v702_v5 = vpop.eup %701 }
 0xe33   :  { %v479_v6 = vadd.f32 1.0, %v702_v5 }
 0xe35   :  { %703 = vrcp.f32 %v479_v6  ;;  %v491_v12 = vand.u32 2147483648, %v479_v6  ;;  %vm485_vm13 = vweird.f32 %v479_v6  ;;  %v489_v13 = vand.u32 2147483647, %v479_v6 }
 0xe37   :  { %v492_v15 = vor.u32 1.1754944e-38, %v491_v12  ;;  %vm490_vm15 = vcmp.eq.f32.partialorder %v489_v13, 8.507059e+37 }
 0xe3b   :  { %v704_v7 = vpop.eup %703 }
 0xe3c   :  { %v481_v8 = vmul.f32 %v704_v7, %v479_v6  ;;  %vm486_vm12 = vweird.f32 %v704_v7 }
 0xe3d   :  { %vm487_vm14 = vmor %vm485_vm13, %vm486_vm12 }
 0xe3e   :  { %v482_v9 = vsub.f32 1.0, %v481_v8 }
 0xe40   :  { %v483_v10 = vmul.f32 %v704_v7, %v482_v9 }
 0xe42   :  { %v484_v11 = vadd.f32 %v704_v7, %v483_v10 }
 0xe44   :  { %v488_v14 = vsel %vm487_vm14, %v704_v7, %v484_v11 }
 0xe45   :  { %v493_v17 = vsel %vm490_vm15, %v492_v15, %v488_v14 }
 0xe46   :  { %v496_v19 = vmul.f32 %v493_v17, %v437_v53 }
 0xea3   :  { %v499_v16 = vpop.permute.xlu1 %498 }
 0xea4   :  { %v501_v18 = vmul.f32 %v499_v16, %v493_v17 }
 0xea6   :  { %503 = vrot.lane.b32.xlu2 %v501_v18, %s717_s15 }
 0xf00   :  { %v504_v20 = vpop.permute.xlu2 %503 }
 0xf01   :  { %v506_v21 = vadd.f32 %v504_v20, %v496_v19 }
 0xf03   :  { %705 = vtanh.f32 %v506_v21 }
 0xf09   :  { %v706_v22 = vpop.eup %705 }
 0xf0a   :  { %509 = vrot.lane.b32.xlu0 %v706_v22, %s716_s14 }
 0xf7c   :  { %v510_v23 = vpop.permute.xlu0 %509 }
 0xf7d   :  { %v512_v24 = vmul.f32 %v510_v23, %v493_v17 }
 0xf7f   :  { %v524_v27 = vpack.c.bf16 %v512_v24, %v512_v24  ;;  %514 = vst [vmem:[#allocation1] ss:$4 sm:$0xff] %v512_v24 }
 0xf81   :  { %526 = vrot.lane.b32.xlu1 %v524_v27, %s717_s15 }
 0xf86   :  { %v515_v36 = vld.sshfl [vmem:[#allocation1] sm:$0xff pattern:$0x73625140] }
 0xff3   :  { %v527_v28 = vpop.permute.xlu1 %526 }
 0xff4   :  { %642 = vmatmul.msk.bf16.vlgmr.msrb.gmra.mxu3 %vm40_vm1, %v527_v28 }
0x1077   :  { %v540_v32 = vpop.f32.mrf.mxu3 }
0x1078   :  { %v544_v33 = vadd.f32 %v540_v32, %v523_v31 }
0x107a   :  { %707 = vtanh.f32 %v544_v33  ;;  %v643_v37 = vmul.f32 -1.442695, %v544_v33 }
0x107c   :  { %709 = vpow2.f32 %v643_v37 }
0x107f   :  { %v542_v34 = vpop.f32.mrf.mxu3 }
0x1080   :  { %v708_v35 = vpop.eup %707 }
0x1081   :  { %567 = vrot.lane.b32.xlu2 %v708_v35, %s716_s14 }
0x1082   :  { %v710_v38 = vpop.eup %709 }
0x1083   :  { %v548_v39 = vadd.f32 1.0, %v710_v38 }
0x1085   :  { %711 = vrcp.f32 %v548_v39  ;;  %v560_v45 = vand.u32 2147483648, %v548_v39  ;;  %vm554_vm2 = vweird.f32 %v548_v39 }
0x1089   :  { %102 = vrot.lane.b32.xlu2 %v758_v63, %s717_s15  ;;  %v558_v63 = vand.u32 2147483647, %v548_v39 }
0x108b   :  { %v712_v40 = vpop.eup %711  ;;  %vm559_vm4 = vcmp.eq.f32.partialorder %v558_v63, 8.507059e+37 }
0x108c   :  { %v550_v41 = vmul.f32 %v712_v40, %v548_v39  ;;  %vm555_vm1 = vweird.f32 %v712_v40 }
0x108d   :  { %vm556_vm3 = vmor %vm554_vm2, %vm555_vm1 }
0x108e   :  { %v551_v42 = vsub.f32 1.0, %v550_v41 }
0x1090   :  { %v552_v43 = vmul.f32 %v712_v40, %v551_v42 }
0x1091   :  { %309 = vrot.lane.b32.xlu2 %v788_v26, %s717_s15  ;;  %v561_v26 = vor.u32 1.1754944e-38, %v560_v45 }
0x1092   :  { %v553_v44 = vadd.f32 %v712_v40, %v552_v43 }
0x1094   :  { %v557_v46 = vsel %vm556_vm3, %v712_v40, %v553_v44 }
0x1095   :  { %v562_v48 = vsel %vm559_vm4, %v561_v26, %v557_v46 }
0x1096   :  { %v565_v53 = vmul.f32 %v562_v48, %v506_v21 }
0x1099   :  { %516 = vrot.lane.b32.xlu2 %v515_v36, %s717_s15 }
0x10db   :  { %v568_v47 = vpop.permute.xlu2 %567 }
0x10dc   :  { %v570_v49 = vmul.f32 %v568_v47, %v562_v48 }
0x10de   :  { %572 = vrot.lane.b32.xlu0 %v570_v49, %s717_s15 }
0x10e3   :  { %v103_v50 = vpop.permute.xlu2 %102 }
0x10e4   :  { %106 = vst.msk [vmem:[%s866_s2] sm:$0x3] %vm16_vm0, %v103_v50 }
0x10e6   :  { %171 = vrot.lane.b32.xlu0 %v768_v29, %s717_s15 }
0x10eb   :  { %v310_v51 = vpop.permute.xlu2 %309 }
0x10ec   :  { %628 = vst.msk [vmem:[%s866_s2 + $0x6] sm:$0x3] %vm16_vm0, %v310_v51 }
0x10ee   :  { %378 = vrot.lane.b32.xlu0 %v798_v57, %s717_s15 }
0x10f3   :  { %v517_v52 = vpop.permute.xlu2 %516 }
0x10f4   :  { %640 = vst.msk [vmem:[%s866_s2 + $0xc] sm:$0x3] %vm16_vm0, %v517_v52 }
0x1150   :  { %v573_v54 = vpop.permute.xlu0 %572 }
0x1151   :  { %v575_v55 = vadd.f32 %v573_v54, %v565_v53 }
0x1153   :  { %713 = vtanh.f32 %v575_v55 }
0x1158   :  { %v172_v29 = vpop.permute.xlu0 %171 }
0x1159   :  { %v714_v56 = vpop.eup %713  ;;  %620 = vst.msk [vmem:[%s866_s2 + $0x2] sm:$0x3] %vm16_vm0, %v172_v29 }
0x115a   :  { %578 = vrot.lane.b32.xlu1 %v714_v56, %s716_s14  ;;  %s718_s14 = smov 96  }
0x1160   :  { %v379_v57 = vpop.permute.xlu0 %378 }
0x1161   :  { %632 = vst.msk [vmem:[%s866_s2 + $0x8] sm:$0x3] %vm16_vm0, %v379_v57 }
0x1162   :  { %240 = vrot.lane.b32.xlu1 %v778_v59, %s717_s15 }
0x116a   :  { %447 = vrot.lane.b32.xlu1 %v446_v25, %s717_s15 }
0x11cc   :  { %v579_v58 = vpop.permute.xlu1 %578 }
0x11cd   :  { %v581_v60 = vmul.f32 %v579_v58, %v562_v48 }
0x11cf   :  { %583 = vst [vmem:[#allocation1] ss:$4 sm:$0xff] %v581_v60 }
0x11d4   :  { %v241_v61 = vpop.permute.xlu1 %240 }
0x11d5   :  { %624 = vst.msk [vmem:[%s866_s2 + $0x4] sm:$0x3] %vm16_vm0, %v241_v61 }
0x11d6   :  { %v584_v62 = vld.sshfl [vmem:[#allocation1] sm:$0xff pattern:$0x73625140] }
0x11d7   :  { %585 = vrot.lane.b32.xlu0 %v584_v62, %s717_s15  ;;  %590 = vst [vmem:[#allocation1] ss:$4 sm:$0xff] %v581_v60 }
0x11dc   :  { %v448_v0 = vpop.permute.xlu1 %447 }
0x11dd   :  { %636 = vst.msk [vmem:[%s866_s2 + $0xa] sm:$0x3] %vm16_vm0, %v448_v0 }
0x11de   :  { %v591_v59 = vld.sshfl [vmem:[#allocation1] sm:$0xff pattern:$0x73625140] }
0x11df   :  { %592 = vrot.lane.b32.xlu1 %v591_v59, %s717_s15  ;;  %597 = vst [vmem:[#allocation1] ss:$4 sm:$0xff] %v575_v55 }
0x11e6   :  { %v598_v1 = vld.sshfl [vmem:[#allocation1] sm:$0xff pattern:$0x73625140] }
0x11e7   :  { %599 = vrot.lane.b32.xlu2 %v598_v1, %s718_s14 }
0x1241   :  { %v600_v2 = vpop.permute.xlu2 %599 }
0x1242   :  { %602 = vst.msk [vmem:[#allocation3] sm:$0x3] %vm16_vm0, %v600_v2 }
0x1249   :  { %v586_v3 = vpop.permute.xlu0 %585 }
0x124a   :  { %644 = vst.msk [vmem:[%s866_s2 + $0xe] sm:$0x3] %vm16_vm0, %v586_v3 }
0x1251   :  { %v593_v4 = vpop.permute.xlu1 %592 }
0x1252   :  { %595 = vst.msk [vmem:[#allocation2] sm:$0x3] %vm16_vm0, %v593_v4 }

</bundles_post_ra>
